<compile_context>
chip_gen: v7x
topology: tpu7x:2x2x1
jax: 0.10.0
libtpu: 0.0.40
codegen_flags: <defaults>
</compile_context>

<pallas_src>
import functools

import jax
import jax.numpy as jnp
import numpy as np
from jax.experimental import pallas as pl
from jax.experimental.pallas import tpu as pltpu


# ------------------------------------------------------------------------------ kernel


def _gated_deconv_kernel(xm_ref, xh0_ref, xh1_ref, wt_ref, b_ref, o_ref):
    """9-tap transposed-conv + gating; one (batch, row-block) tile per grid step.

    xm_ref:  (1, TH, W+2, Cin)    main rows of the zero-padded NHWC input (bf16)
    xh0_ref: (1, 1,  W+2, Cin)    halo row q0+TH
    xh1_ref: (1, 1,  W+2, Cin)    halo row q0+TH+1
    wt_ref:  (9, Cin, 8*Coutp)    per-tap fused [feature | mask] weights (bf16)
    b_ref:   (1, 8*Coutp)         fused bias (f32)
    o_ref:   (1, TH, W, 4*Coutp)  gated output, columns ordered (ph, pw, co)
    """
    th = xm_ref.shape[1]
    wcols = o_ref.shape[2]            # W
    cin = xm_ref.shape[3]
    gcols = o_ref.shape[3]            # 4*Coutp (multiple of 128 -> lane-aligned split)

    # Finish the haloed slab in VMEM (major-axis concat is cheap).
    slab = jnp.concatenate([xm_ref[0], xh0_ref[0], xh1_ref[0]], axis=0)   # (TH+2, W+2, Cin)

    # 9-tap accumulation: each tap is a lane-aligned (rows, Cin) @ (Cin, 8*Coutp) dot.
    # (Roughly half the fused weight entries are structurally zero, but the op is
    #  HBM-bound at these shapes so the dense form is kept for lane alignment.)
    acc = jnp.zeros((th * wcols, 2 * gcols), jnp.float32)
    for dh in range(3):
        for dw in range(3):
            xs = slab[dh:dh + th, dw:dw + wcols, :].reshape(th * wcols, cin)
            acc = acc + jnp.dot(xs, wt_ref[dh * 3 + dw],
                                preferred_element_type=jnp.float32)
    acc = acc + b_ref[...]

    f = acc[:, :gcols]                 # feature branch
    m = acc[:, gcols:]                 # mask branch
    gated = jnp.maximum(f, 0.0) * jax.nn.sigmoid(m)
    o_ref[0] = gated.reshape(th, wcols, gcols).astype(o_ref.dtype)


# ------------------------------------------------------------------- weight / bias prep


def _build_tap_weights(wf, wm, coutp):
    """Map the two ConvTranspose2d weights (Cin, Cout, 4, 4) to per-tap matmul weights
    (9, Cin, 8*Coutp).

    For output pixel oh = 2*q + ph the contributing input rows are ih = q + (dh - 1),
    dh in {0,1,2}, with kernel tap kh = ph + 1 - 2*(dh - 1), kept iff 0 <= kh < 4
    (same along the width).  Output columns are ordered [feature | mask] x (ph, pw, co);
    co is zero-padded to Coutp so 4*Coutp is a multiple of 128.
    """
    cin, cout, k, _ = wf.shape
    taps = jnp.zeros((3, 3, cin, 2, 2, 2, coutp), jnp.float32)
    for dh in range(3):
        for dw in range(3):
            for ph in range(2):
                for pw in range(2):
                    kh = ph + 1 - 2 * (dh - 1)
                    kw = pw + 1 - 2 * (dw - 1)
                    if 0 <= kh < k and 0 <= kw < k:
                        taps = taps.at[dh, dw, :, 0, ph, pw, :cout].set(wf[:, :, kh, kw])
                        taps = taps.at[dh, dw, :, 1, ph, pw, :cout].set(wm[:, :, kh, kw])
    return taps.reshape(9, cin, 8 * coutp)


def _build_fused_bias(bf, bm, coutp):
    cout = bf.shape[0]
    b = jnp.zeros((2, 2, 2, coutp), jnp.float32)
    b = b.at[0, :, :, :cout].set(bf.astype(jnp.float32))
    b = b.at[1, :, :, :cout].set(bm.astype(jnp.float32))
    return b.reshape(1, 8 * coutp)


# ------------------------------------------------------------------- tiling heuristics


def _round_up(x, m):
    return (x + m - 1) // m * m


def _tile_bytes(shape, itemsize):
    """VMEM footprint of a block, rounded up to its (sublane, 128-lane) tiles."""
    s = list(shape)
    s[-1] = _round_up(s[-1], 128)
    if len(s) >= 2:
        s[-2] = _round_up(s[-2], max(8, 32 // itemsize))
    total = itemsize
    for d in s:
        total *= d
    return total


def _vmem_need(th, w, cin, coutp, in_b, out_b):
    """Conservative per-step VMEM estimate: double-buffered pipeline blocks plus the
    in-kernel working set (assembled slab, f32 accumulator, shifted tap operand)."""
    wp2 = w + 2
    gcols = 4 * coutp
    pipelined = 2 * (_tile_bytes((th, wp2, cin), in_b)          # main row block
                     + 2 * _tile_bytes((1, wp2, cin), in_b)     # two halo rows
                     + _tile_bytes((9, cin, 2 * gcols), in_b)   # fused tap weights
                     + _tile_bytes((1, 2 * gcols), 4)           # fused bias
                     + _tile_bytes((th, w, gcols), out_b))      # output tile
    working = (_tile_bytes((th + 2, wp2, cin), in_b)
               + _tile_bytes((th * w, 2 * gcols), 4)
               + _tile_bytes((th * w, cin), in_b))
    return pipelined + working


def _chip_info():
    """Return (per-core VMEM bytes, number of TensorCores sharing the grid)."""
    try:
        vmem_cap = int(pltpu.get_tpu_info().vmem_capacity_bytes)
    except Exception:           # not on a TPU host / field renamed -> conservative default
        vmem_cap = 64 << 20
    # v7x: 64 MiB VMEM per TC and 2 TCs per chip; v5e/v6e: 128 MiB and a single TC.
    num_tc = 2 if vmem_cap <= (64 << 20) else 1
    return vmem_cap, num_tc


def _pick_row_tile(n, h, w, cin, coutp, in_b, out_b, vmem_cap, num_tc, row_tile):
    """Largest divisor of H whose blocks fit a conservative VMEM budget; only forces
    >= 2 grid steps when the chip actually has 2 TensorCores (v7x)."""
    if row_tile is not None:
        if h % row_tile != 0:
            raise ValueError(f"row_tile={row_tile} must divide H={h}")
        return row_tile
    budget = int(0.42 * vmem_cap)   # ~27 MiB on v7x (64 MiB/TC), ~54 MiB on 128 MiB chips
    divisors = sorted((d for d in range(1, h + 1) if h % d == 0), reverse=True)
    smallest = divisors[-1]
    for th in divisors:
        if th != smallest:
            if th * w > 4096:                                   # bound the f32 accumulator
                continue
            if _vmem_need(th, w, cin, coutp, in_b, out_b) > budget:
                continue
            if num_tc > 1 and n * (h // th) < num_tc:
                continue                                        # give both v7x TCs work
        return th
    return smallest


# -------------------------------------------------------------------------- entry point


@functools.partial(
    jax.jit,
    static_argnames=("th", "coutp", "compute_dtype", "out_dtype", "vmem_limit"))
def _gated_deconv2d_impl(x, wf, bf, wm, bm, *, th, coutp, compute_dtype, out_dtype,
                         vmem_limit):
    n, cin, h, w = x.shape
    cout = wf.shape[1]
    nb = h // th
    gcols = 4 * coutp
    cdt = compute_dtype
    in_b = jnp.dtype(cdt).itemsize

    # Layout glue (one fused pass, ~1x input bytes): NCHW -> NHWC, bf16 cast, zero halo.
    x_pad = jnp.pad(jnp.transpose(x, (0, 2, 3, 1)).astype(cdt),
                    ((0, 0), (1, 1), (1, 1), (0, 0)))           # (N, H+2, W+2, Cin)

    wt = _build_tap_weights(wf, wm, coutp).astype(cdt)          # (9, Cin, 8*Coutp)
    bfused = _build_fused_bias(bf, bm, coutp)                   # (1, 8*Coutp) f32

    cost = pl.CostEstimate(
        flops=2 * n * h * w * 9 * cin * 2 * gcols,
        transcendentals=n * h * w * gcols,
        bytes_accessed=int(x_pad.size * in_b + wt.size * in_b + bfused.size * 4
                           + n * h * w * gcols * in_b),
    )

    gated = pl.pallas_call(
        _gated_deconv_kernel,
        out_shape=jax.ShapeDtypeStruct((n, h, w, gcols), cdt),
        grid_spec=pltpu.PrefetchScalarGridSpec(
            num_scalar_prefetch=0,
            grid=(n, nb),
            in_specs=[
                # TH main rows of padded image b (halo finished in-kernel).
                pl.BlockSpec((1, th, w + 2, cin), lambda b, i: (b, i, 0, 0)),
                # Two single-row halo fetches: padded rows i*TH+TH and i*TH+TH+1
                # (block size 1 -> block index == row index, so overlap is legal).
                pl.BlockSpec((1, 1, w + 2, cin), lambda b, i: (b, i * th + th, 0, 0)),
                pl.BlockSpec((1, 1, w + 2, cin), lambda b, i: (b, i * th + th + 1, 0, 0)),
                # Constant blocks: fused per-tap weights + fused bias.
                pl.BlockSpec((9, cin, 2 * gcols), lambda b, i: (0, 0, 0)),
                pl.BlockSpec((1, 2 * gcols), lambda b, i: (0, 0)),
            ],
            out_specs=pl.BlockSpec((1, th, w, gcols), lambda b, i: (b, i, 0, 0)),
        ),
        compiler_params=pltpu.CompilerParams(
            dimension_semantics=("parallel", "parallel"),
            vmem_limit_bytes=vmem_limit),
        cost_estimate=cost,
    )(x_pad, x_pad, x_pad, wt, bfused)

    # De-interleave sub-pixel parities -> NCHW (single fused slice+transpose+cast pass).
    g = gated.reshape(n, h, w, 2, 2, coutp)[..., :cout]
    out = jnp.transpose(g, (0, 5, 1, 3, 2, 4)).reshape(n, cout, 2 * h, 2 * w)
    return out.astype(out_dtype)


def gated_deconv2d(x, wf, bf, wm, bm, *, kernel_size=4, stride=2, padding=1,
                   out_dtype=None, compute_dtype=jnp.bfloat16, row_tile=None):
    """ReLU(conv_transpose(x; wf, bf)) * sigmoid(conv_transpose(x; wm, bm)).

    x: (N, Cin, H, W) NCHW; weights: (Cin, Cout, 4, 4); biases: (Cout,).
    Returns (N, Cout, 2H, 2W) in `out_dtype` (default: x.dtype).
    """
    assert (kernel_size, stride, padding) == (4, 2, 1), "kernel built for the module defaults"
    n, cin, h, w = x.shape
    cout = wf.shape[1]
    coutp = _round_up(cout, 32)          # 4*Coutp % 128 == 0 -> lane-dense split / stores
    out_dtype = jnp.dtype(x.dtype if out_dtype is None else out_dtype)
    compute_dtype = jnp.dtype(compute_dtype)
    in_b = compute_dtype.itemsize

    vmem_cap, num_tc = _chip_info()
    th = _pick_row_tile(n, h, w, cin, coutp, in_b, in_b, vmem_cap, num_tc, row_tile)
    need = _vmem_need(th, w, cin, coutp, in_b, in_b)
    vmem_limit = int(min(int(0.75 * vmem_cap), max(32 << 20, 2 * need)))
    vmem_limit = max(vmem_limit, need + (2 << 20))

    return _gated_deconv2d_impl(
        x, wf, bf, wm, bm, th=th, coutp=coutp,
        compute_dtype=compute_dtype, out_dtype=out_dtype, vmem_limit=vmem_limit)


# --------------------------------------------------------------------------- reference


def _reference(x, wf, bf, wm, bm, k=4, s=2, p=1):
    """Pure-JAX f32 reference matching torch.nn.ConvTranspose2d semantics."""
    def deconv(w, b):
        w_oihw = jnp.transpose(jnp.flip(w, axis=(2, 3)), (1, 0, 2, 3))
        y = jax.lax.conv_general_dilated(
            x, w_oihw, window_strides=(1, 1),
            padding=[(k - 1 - p, k - 1 - p)] * 2,
            lhs_dilation=(s, s),
            dimension_numbers=("NCHW", "OIHW", "NCHW"),
            precision=jax.lax.Precision.HIGHEST)
        return y + b[None, :, None, None]

    f = deconv(wf, bf)
    m = deconv(wm, bm)
    return jnp.maximum(f, 0.0) * jax.nn.sigmoid(m)


if __name__ == "__main__":
    N, CIN, COUT, H, W = 2, 4, 32, 16, 16
    K, S, P = 4, 2, 1

    key = jax.random.PRNGKey(0)
    k1, k2, k3, k4, k5 = jax.random.split(key, 5)
    bound = 1.0 / np.sqrt(CIN * K * K)   # PyTorch-style uniform init (deterministic)
    wf = jax.random.uniform(k1, (CIN, COUT, K, K), jnp.float32, -bound, bound)
    bf = jax.random.uniform(k2, (COUT,), jnp.float32, -bound, bound)
    wm = jax.random.uniform(k3, (CIN, COUT, K, K), jnp.float32, -bound, bound)
    bm = jax.random.uniform(k4, (COUT,), jnp.float32, -bound, bound)
    x = jax.random.normal(k5, (N, CIN, H, W), jnp.float32)

    out = gated_deconv2d(x, wf, bf, wm, bm)
    out = jax.block_until_ready(out)

    assert out.shape == (N, COUT, S * H, S * W), out.shape
    ref = _reference(x, wf, bf, wm, bm, K, S, P)
    # inputs/weights and the kernel output are bf16 (f32 MXU accumulation), so allow
    # ~1% combined quantization error vs the f32 reference.
    np.testing.assert_allclose(np.asarray(out), np.asarray(ref), rtol=2e-2, atol=2e-2)
    print("KERNEL_OK")
</pallas_src>

<mosaic_0001>
module attributes {stable_mosaic.version = 11 : i64} {
  func.func @_gated_deconv_kernel(%arg0: i32, %arg1: i32, %arg2: memref<1x16x18x4xbf16, #tpu.memory_space<vmem>>, %arg3: memref<1x1x18x4xbf16, #tpu.memory_space<vmem>>, %arg4: memref<1x1x18x4xbf16, #tpu.memory_space<vmem>>, %arg5: memref<9x4x256xbf16, #tpu.memory_space<vmem>>, %arg6: memref<1x256xf32, #tpu.memory_space<vmem>>, %arg7: memref<1x16x16x128xbf16, #tpu.memory_space<vmem>>) attributes {dimension_semantics = [#tpu.dimension_semantics<parallel>, #tpu.dimension_semantics<parallel>], iteration_bounds = array<i64: 2, 1>, scalar_prefetch = 0 : i64, scratch_operands = 0 : i64, tpu.core_type = #tpu.core_type<tc>, window_params = [{transform_indices = @transform_0, window_bounds = array<i64: 1, 16, 18, 4>}, {transform_indices = @transform_1, window_bounds = array<i64: 1, 1, 18, 4>}, {transform_indices = @transform_2, window_bounds = array<i64: 1, 1, 18, 4>}, {pipeline_mode = #tpu.pipeline_mode<synchronous>, transform_indices = @transform_3, window_bounds = array<i64: 9, 4, 256>}, {pipeline_mode = #tpu.pipeline_mode<synchronous>, transform_indices = @transform_4, window_bounds = array<i64: 1, 256>}, {transform_indices = @transform_5, window_bounds = array<i64: 1, 16, 16, 128>}]} {
    %c0 = arith.constant 0 : index
    %c0_0 = arith.constant 0 : index
    %c0_1 = arith.constant 0 : index
    %c0_2 = arith.constant 0 : index
    %0 = vector.load %arg2[%c0, %c0_0, %c0_1, %c0_2] : memref<1x16x18x4xbf16, #tpu.memory_space<vmem>>, vector<1x16x18x4xbf16>
    %1 = vector.shape_cast %0 : vector<1x16x18x4xbf16> to vector<16x18x4xbf16>
    %c0_3 = arith.constant 0 : index
    %c0_4 = arith.constant 0 : index
    %c0_5 = arith.constant 0 : index
    %c0_6 = arith.constant 0 : index
    %2 = vector.load %arg3[%c0_3, %c0_4, %c0_5, %c0_6] : memref<1x1x18x4xbf16, #tpu.memory_space<vmem>>, vector<1x1x18x4xbf16>
    %3 = vector.shape_cast %2 : vector<1x1x18x4xbf16> to vector<1x18x4xbf16>
    %c0_7 = arith.constant 0 : index
    %c0_8 = arith.constant 0 : index
    %c0_9 = arith.constant 0 : index
    %c0_10 = arith.constant 0 : index
    %4 = vector.load %arg4[%c0_7, %c0_8, %c0_9, %c0_10] : memref<1x1x18x4xbf16, #tpu.memory_space<vmem>>, vector<1x1x18x4xbf16>
    %5 = vector.shape_cast %4 : vector<1x1x18x4xbf16> to vector<1x18x4xbf16>
    %6 = tpu.concatenate %1, %3, %5 in 0 : vector<16x18x4xbf16>, vector<1x18x4xbf16>, vector<1x18x4xbf16> -> vector<18x18x4xbf16>
    %cst = arith.constant 0.000000e+00 : f32
    %7 = vector.broadcast %cst : f32 to vector<256x256xf32>
    %8 = vector.extract_strided_slice %6 {offsets = [0, 0, 0], sizes = [16, 16, 4], strides = [1, 1, 1]} : vector<18x18x4xbf16> to vector<16x16x4xbf16>
    %9 = vector.shape_cast %8 : vector<16x16x4xbf16> to vector<256x4xbf16>
    %c0_11 = arith.constant 0 : index
    %c0_12 = arith.constant 0 : index
    %c0_13 = arith.constant 0 : index
    %10 = vector.load %arg5[%c0_11, %c0_12, %c0_13] : memref<9x4x256xbf16, #tpu.memory_space<vmem>>, vector<1x4x256xbf16>
    %11 = vector.shape_cast %10 : vector<1x4x256xbf16> to vector<4x256xbf16>
    %cst_14 = arith.constant dense<0.000000e+00> : vector<256x256xf32>
    %12 = tpu.matmul %9, %11, %cst_14 {dimension_numbers = #tpu.dot_dimension_numbers<[1], [0], [0], [1], [0, 0, 1, 1], [], []>} : vector<256x4xbf16>, vector<4x256xbf16>, vector<256x256xf32> -> vector<256x256xf32>
    %13 = arith.addf %7, %12 : vector<256x256xf32>
    %14 = vector.extract_strided_slice %6 {offsets = [0, 1, 0], sizes = [16, 16, 4], strides = [1, 1, 1]} : vector<18x18x4xbf16> to vector<16x16x4xbf16>
    %15 = vector.shape_cast %14 : vector<16x16x4xbf16> to vector<256x4xbf16>
    %c1 = arith.constant 1 : index
    %c0_15 = arith.constant 0 : index
    %c0_16 = arith.constant 0 : index
    %16 = vector.load %arg5[%c1, %c0_15, %c0_16] : memref<9x4x256xbf16, #tpu.memory_space<vmem>>, vector<1x4x256xbf16>
    %17 = vector.shape_cast %16 : vector<1x4x256xbf16> to vector<4x256xbf16>
    %cst_17 = arith.constant dense<0.000000e+00> : vector<256x256xf32>
    %18 = tpu.matmul %15, %17, %cst_17 {dimension_numbers = #tpu.dot_dimension_numbers<[1], [0], [0], [1], [0, 0, 1, 1], [], []>} : vector<256x4xbf16>, vector<4x256xbf16>, vector<256x256xf32> -> vector<256x256xf32>
    %19 = arith.addf %13, %18 : vector<256x256xf32>
    %20 = vector.extract_strided_slice %6 {offsets = [0, 2, 0], sizes = [16, 16, 4], strides = [1, 1, 1]} : vector<18x18x4xbf16> to vector<16x16x4xbf16>
    %21 = vector.shape_cast %20 : vector<16x16x4xbf16> to vector<256x4xbf16>
    %c2 = arith.constant 2 : index
    %c0_18 = arith.constant 0 : index
    %c0_19 = arith.constant 0 : index
    %22 = vector.load %arg5[%c2, %c0_18, %c0_19] : memref<9x4x256xbf16, #tpu.memory_space<vmem>>, vector<1x4x256xbf16>
    %23 = vector.shape_cast %22 : vector<1x4x256xbf16> to vector<4x256xbf16>
    %cst_20 = arith.constant dense<0.000000e+00> : vector<256x256xf32>
    %24 = tpu.matmul %21, %23, %cst_20 {dimension_numbers = #tpu.dot_dimension_numbers<[1], [0], [0], [1], [0, 0, 1, 1], [], []>} : vector<256x4xbf16>, vector<4x256xbf16>, vector<256x256xf32> -> vector<256x256xf32>
    %25 = arith.addf %19, %24 : vector<256x256xf32>
    %26 = vector.extract_strided_slice %6 {offsets = [1, 0, 0], sizes = [16, 16, 4], strides = [1, 1, 1]} : vector<18x18x4xbf16> to vector<16x16x4xbf16>
    %27 = vector.shape_cast %26 : vector<16x16x4xbf16> to vector<256x4xbf16>
    %c3 = arith.constant 3 : index
    %c0_21 = arith.constant 0 : index
    %c0_22 = arith.constant 0 : index
    %28 = vector.load %arg5[%c3, %c0_21, %c0_22] : memref<9x4x256xbf16, #tpu.memory_space<vmem>>, vector<1x4x256xbf16>
    %29 = vector.shape_cast %28 : vector<1x4x256xbf16> to vector<4x256xbf16>
    %cst_23 = arith.constant dense<0.000000e+00> : vector<256x256xf32>
    %30 = tpu.matmul %27, %29, %cst_23 {dimension_numbers = #tpu.dot_dimension_numbers<[1], [0], [0], [1], [0, 0, 1, 1], [], []>} : vector<256x4xbf16>, vector<4x256xbf16>, vector<256x256xf32> -> vector<256x256xf32>
    %31 = arith.addf %25, %30 : vector<256x256xf32>
    %32 = vector.extract_strided_slice %6 {offsets = [1, 1, 0], sizes = [16, 16, 4], strides = [1, 1, 1]} : vector<18x18x4xbf16> to vector<16x16x4xbf16>
    %33 = vector.shape_cast %32 : vector<16x16x4xbf16> to vector<256x4xbf16>
    %c4 = arith.constant 4 : index
    %c0_24 = arith.constant 0 : index
    %c0_25 = arith.constant 0 : index
    %34 = vector.load %arg5[%c4, %c0_24, %c0_25] : memref<9x4x256xbf16, #tpu.memory_space<vmem>>, vector<1x4x256xbf16>
    %35 = vector.shape_cast %34 : vector<1x4x256xbf16> to vector<4x256xbf16>
    %cst_26 = arith.constant dense<0.000000e+00> : vector<256x256xf32>
    %36 = tpu.matmul %33, %35, %cst_26 {dimension_numbers = #tpu.dot_dimension_numbers<[1], [0], [0], [1], [0, 0, 1, 1], [], []>} : vector<256x4xbf16>, vector<4x256xbf16>, vector<256x256xf32> -> vector<256x256xf32>
    %37 = arith.addf %31, %36 : vector<256x256xf32>
    %38 = vector.extract_strided_slice %6 {offsets = [1, 2, 0], sizes = [16, 16, 4], strides = [1, 1, 1]} : vector<18x18x4xbf16> to vector<16x16x4xbf16>
    %39 = vector.shape_cast %38 : vector<16x16x4xbf16> to vector<256x4xbf16>
    %c5 = arith.constant 5 : index
    %c0_27 = arith.constant 0 : index
    %c0_28 = arith.constant 0 : index
    %40 = vector.load %arg5[%c5, %c0_27, %c0_28] : memref<9x4x256xbf16, #tpu.memory_space<vmem>>, vector<1x4x256xbf16>
    %41 = vector.shape_cast %40 : vector<1x4x256xbf16> to vector<4x256xbf16>
    %cst_29 = arith.constant dense<0.000000e+00> : vector<256x256xf32>
    %42 = tpu.matmul %39, %41, %cst_29 {dimension_numbers = #tpu.dot_dimension_numbers<[1], [0], [0], [1], [0, 0, 1, 1], [], []>} : vector<256x4xbf16>, vector<4x256xbf16>, vector<256x256xf32> -> vector<256x256xf32>
    %43 = arith.addf %37, %42 : vector<256x256xf32>
    %44 = vector.extract_strided_slice %6 {offsets = [2, 0, 0], sizes = [16, 16, 4], strides = [1, 1, 1]} : vector<18x18x4xbf16> to vector<16x16x4xbf16>
    %45 = vector.shape_cast %44 : vector<16x16x4xbf16> to vector<256x4xbf16>
    %c6 = arith.constant 6 : index
    %c0_30 = arith.constant 0 : index
    %c0_31 = arith.constant 0 : index
    %46 = vector.load %arg5[%c6, %c0_30, %c0_31] : memref<9x4x256xbf16, #tpu.memory_space<vmem>>, vector<1x4x256xbf16>
    %47 = vector.shape_cast %46 : vector<1x4x256xbf16> to vector<4x256xbf16>
    %cst_32 = arith.constant dense<0.000000e+00> : vector<256x256xf32>
    %48 = tpu.matmul %45, %47, %cst_32 {dimension_numbers = #tpu.dot_dimension_numbers<[1], [0], [0], [1], [0, 0, 1, 1], [], []>} : vector<256x4xbf16>, vector<4x256xbf16>, vector<256x256xf32> -> vector<256x256xf32>
    %49 = arith.addf %43, %48 : vector<256x256xf32>
    %50 = vector.extract_strided_slice %6 {offsets = [2, 1, 0], sizes = [16, 16, 4], strides = [1, 1, 1]} : vector<18x18x4xbf16> to vector<16x16x4xbf16>
    %51 = vector.shape_cast %50 : vector<16x16x4xbf16> to vector<256x4xbf16>
    %c7 = arith.constant 7 : index
    %c0_33 = arith.constant 0 : index
    %c0_34 = arith.constant 0 : index
    %52 = vector.load %arg5[%c7, %c0_33, %c0_34] : memref<9x4x256xbf16, #tpu.memory_space<vmem>>, vector<1x4x256xbf16>
    %53 = vector.shape_cast %52 : vector<1x4x256xbf16> to vector<4x256xbf16>
    %cst_35 = arith.constant dense<0.000000e+00> : vector<256x256xf32>
    %54 = tpu.matmul %51, %53, %cst_35 {dimension_numbers = #tpu.dot_dimension_numbers<[1], [0], [0], [1], [0, 0, 1, 1], [], []>} : vector<256x4xbf16>, vector<4x256xbf16>, vector<256x256xf32> -> vector<256x256xf32>
    %55 = arith.addf %49, %54 : vector<256x256xf32>
    %56 = vector.extract_strided_slice %6 {offsets = [2, 2, 0], sizes = [16, 16, 4], strides = [1, 1, 1]} : vector<18x18x4xbf16> to vector<16x16x4xbf16>
    %57 = vector.shape_cast %56 : vector<16x16x4xbf16> to vector<256x4xbf16>
    %c8 = arith.constant 8 : index
    %c0_36 = arith.constant 0 : index
    %c0_37 = arith.constant 0 : index
    %58 = vector.load %arg5[%c8, %c0_36, %c0_37] : memref<9x4x256xbf16, #tpu.memory_space<vmem>>, vector<1x4x256xbf16>
    %59 = vector.shape_cast %58 : vector<1x4x256xbf16> to vector<4x256xbf16>
    %cst_38 = arith.constant dense<0.000000e+00> : vector<256x256xf32>
    %60 = tpu.matmul %57, %59, %cst_38 {dimension_numbers = #tpu.dot_dimension_numbers<[1], [0], [0], [1], [0, 0, 1, 1], [], []>} : vector<256x4xbf16>, vector<4x256xbf16>, vector<256x256xf32> -> vector<256x256xf32>
    %61 = arith.addf %55, %60 : vector<256x256xf32>
    %c0_39 = arith.constant 0 : index
    %c0_40 = arith.constant 0 : index
    %62 = vector.load %arg6[%c0_39, %c0_40] : memref<1x256xf32, #tpu.memory_space<vmem>>, vector<1x256xf32>
    %63 = vector.broadcast %62 : vector<1x256xf32> to vector<256x256xf32>
    %64 = arith.addf %61, %63 : vector<256x256xf32>
    %65 = vector.extract_strided_slice %64 {offsets = [0, 0], sizes = [256, 128], strides = [1, 1]} : vector<256x256xf32> to vector<256x128xf32>
    %66 = vector.extract_strided_slice %64 {offsets = [0, 128], sizes = [256, 128], strides = [1, 1]} : vector<256x256xf32> to vector<256x128xf32>
    %cst_41 = arith.constant 0.000000e+00 : f32
    %67 = vector.broadcast %cst_41 : f32 to vector<256x128xf32>
    %68 = arith.maximumf %65, %67 : vector<256x128xf32>
    %69 = arith.negf %66 : vector<256x128xf32>
    %70 = math.exp %69 : vector<256x128xf32>
    %cst_42 = arith.constant 1.000000e+00 : f32
    %71 = vector.broadcast %cst_42 : f32 to vector<256x128xf32>
    %72 = arith.addf %71, %70 : vector<256x128xf32>
    %73 = arith.divf %71, %72 : vector<256x128xf32>
    %74 = arith.mulf %68, %73 : vector<256x128xf32>
    %75 = vector.shape_cast %74 : vector<256x128xf32> to vector<16x16x128xf32>
    %76 = arith.truncf %75 : vector<16x16x128xf32> to vector<16x16x128xbf16>
    %c0_43 = arith.constant 0 : index
    %c0_44 = arith.constant 0 : index
    %c0_45 = arith.constant 0 : index
    %c0_46 = arith.constant 0 : index
    %77 = vector.load %arg7[%c0_43, %c0_44, %c0_45, %c0_46] : memref<1x16x16x128xbf16, #tpu.memory_space<vmem>>, vector<1x16x16x128xbf16>
    %78 = vector.shape_cast %77 : vector<1x16x16x128xbf16> to vector<16x16x128xbf16>
    %79 = vector.shape_cast %76 : vector<16x16x128xbf16> to vector<1x16x16x128xbf16>
    tpu.vector_store %arg7[%c0_43, %c0_44, %c0_45, %c0_46], %79 {strides = array<i32>} : memref<1x16x16x128xbf16, #tpu.memory_space<vmem>>, vector<1x16x16x128xbf16>,
    return
  }
  func.func @transform_0(%arg0: i32, %arg1: i32) -> (i32, i32, i32, i32) {
    %c0_i32 = arith.constant 0 : i32
    %c0_i32_0 = arith.constant 0 : i32
    %c0_i32_1 = arith.constant 0 : i32
    return %arg0, %arg1, %c0_i32, %c0_i32_0 : i32, i32, i32, i32
  }
  func.func @transform_1(%arg0: i32, %arg1: i32) -> (i32, i32, i32, i32) {
    %c16_i32 = arith.constant 16 : i32
    %0 = arith.muli %arg1, %c16_i32 : i32
    %c16_i32_0 = arith.constant 16 : i32
    %1 = arith.addi %0, %c16_i32_0 : i32
    %c0_i32 = arith.constant 0 : i32
    %c0_i32_1 = arith.constant 0 : i32
    %c0_i32_2 = arith.constant 0 : i32
    return %arg0, %1, %c0_i32, %c0_i32_1 : i32, i32, i32, i32
  }
  func.func @transform_2(%arg0: i32, %arg1: i32) -> (i32, i32, i32, i32) {
    %c16_i32 = arith.constant 16 : i32
    %0 = arith.muli %arg1, %c16_i32 : i32
    %c16_i32_0 = arith.constant 16 : i32
    %1 = arith.addi %0, %c16_i32_0 : i32
    %c1_i32 = arith.constant 1 : i32
    %2 = arith.addi %1, %c1_i32 : i32
    %c0_i32 = arith.constant 0 : i32
    %c0_i32_1 = arith.constant 0 : i32
    %c0_i32_2 = arith.constant 0 : i32
    return %arg0, %2, %c0_i32, %c0_i32_1 : i32, i32, i32, i32
  }
  func.func @transform_3(%arg0: i32, %arg1: i32) -> (i32, i32, i32) {
    %c0_i32 = arith.constant 0 : i32
    %c0_i32_0 = arith.constant 0 : i32
    %c0_i32_1 = arith.constant 0 : i32
    %c0_i32_2 = arith.constant 0 : i32
    return %c0_i32, %c0_i32_0, %c0_i32_1 : i32, i32, i32
  }
  func.func @transform_4(%arg0: i32, %arg1: i32) -> (i32, i32) {
    %c0_i32 = arith.constant 0 : i32
    %c0_i32_0 = arith.constant 0 : i32
    %c0_i32_1 = arith.constant 0 : i32
    return %c0_i32, %c0_i32_0 : i32, i32
  }
  func.func @transform_5(%arg0: i32, %arg1: i32) -> (i32, i32, i32, i32) {
    %c0_i32 = arith.constant 0 : i32
    %c0_i32_0 = arith.constant 0 : i32
    %c0_i32_1 = arith.constant 0 : i32
    return %arg0, %arg1, %c0_i32, %c0_i32_0 : i32, i32, i32, i32
  }
}

</mosaic_0001>

<bundles_post_ra>
// kernel: _gated_deconv2d_impl.1
= control target key start
LH: loop header
LB: loop body
LE: loop exit
PB: predicated region body
PF: predicated region fallthrough
CT: control target
= control target key end

     0   :  { %s5554_s18 = smov 0   ;;  %s5556_s19 = smov 0   ;;  %s6991_s0 = inlined_call_operand.vmem [shape: bf16[2,18,18,4], index: 0, kind: input, shape index: {}, may-alias: {0,1,2}]   ;;  %s6992_s1 = inlined_call_operand.vmem [shape: bf16[2,18,18,4], index: 1, kind: input, shape index: {}, may-alias: {0,1,2}]   ;;  %s6993_s2 = inlined_call_operand.vmem [shape: bf16[2,18,18,4], index: 2, kind: input, shape index: {}, may-alias: {0,1,2}]   ;;  %s6994_s3 = inlined_call_operand.vmem [shape: bf16[9,4,256], index: 3, kind: input, shape index: {}]   ;;  %s6995_s4 = inlined_call_operand.vmem [shape: f32[1,256], index: 4, kind: input, shape index: {}]   ;;  %s6996_s5 = inlined_call_operand.vmem [shape: bf16[2,16,16,128], index: 5, kind: output, shape index: {}]  }
   0x1   :  { %s5558_s20 = smov 0  }
   0x2 LB: > { %s27_s21 = sadd.s32 1, %s5517_s19  ;;  %p4360_p0 = scmp.ge.s32.totalorder %s5521_s20, 1  ;;  %s5521_s20 = sphi %s5558_s20, %s15_s20   ;;  %s5517_s19 = sphi %s5556_s19, %s7075_s19   ;;  %s5513_s18 = sphi %s5554_s18, %s7074_s18  }
   0x3   : > { %p29_p1 = scmp.ge.s32.totalorder %s27_s21, 2  ;;  %p267_p2 = scmp.lt.s32.totalorder %s5521_s20, 3 }
   0x5   : > { %s7077_s21 = smov (%p29_p1, %s27_s21), 0  ;;  %p268_p3 = pnand %p4360_p0, %p267_p2 }
   0x7   : > { %271 = sbr.rel (%p268_p3) target bundleno = 855 (0x357), region = 40 }
   0xe   : > { %v4383_v0 = vld.sshfl [vmem:[%s6994_s3 + $0x4] sm:$0x33 pattern:$0x76325410]  ;;  %vm941_vm0 = vcmask 1041408   ;;  %v7003_v4 = vmov 0  }
   0xf   : > { %v891_v1 = vcombine.high %v4383_v0, %v4383_v0  ;;  %v4508_v2 = vld.sshfl [vmem:[%s6994_s3 + $0x10] sm:$0x33 pattern:$0x76325410]  ;;  %v943_v3 = vsel %vm941_vm0, %v4383_v0, 0  ;;  %980 = vmatprep.mubr.bf16.mxu1 %v7003_v4  ;;  %2339 = vmatprep.mubr.bf16.mxu0 %v7003_v4  ;;  %p338_p4 = scmp.lt.s32.totalorder %s5513_s18, 1 }
  0x10   : > { %v5581_v5 = vcombine.high %v4508_v2, %v4508_v2  ;;  %v5584_v6 = vsel %vm941_vm0, %v4508_v2, 0  ;;  %v4417_v7 = vld.sshfl [vmem:[%s6994_s3] sm:$0x33 pattern:$0x76325410]  ;;  %vm892_vm2 = vcmask 31744  }
  0x11   : > { %7026 = vst [vmem:[#allocation3_spill] sm:$0xff] %v5584_v6  ;;  %4384 = vmatprep.subr.msk.bf16.mxu1 %vm941_vm0, %v891_v1  ;;  %v1229_v8 = vcombine.high %v4417_v7, %v4417_v7  ;;  %v4529_v9 = vld.sshfl [vmem:[%s6994_s3 + $0x14] sm:$0x33 pattern:$0x76325410]  ;;  %s7079_s18 = smov (!%p338_p4, %s5513_s18), 1 }
  0x12   : > { %7025 = vst [vmem:[#allocation2_spill] sm:$0xff] %v5581_v5  ;;  %4509 = vmatprep.subr.msk.bf16.mxu0 %vm941_vm0, %v5581_v5  ;;  %949 = vmatpush1.bf16.msra.mxu1 %v943_v3  ;;  %v2585_v10 = vcombine.high %v4529_v9, %v4529_v9  ;;  %s5600_s30 = smul.u32 216, %s7079_s18  ;;  %vm446_vm1 = vsmask.f32 3328  ;;  %v1279_v11 = vsel %vm941_vm0, %v4417_v7, 0  ;;  %v2590_v42 = vsel %vm941_vm0, %v4529_v9, 0 }
  0x13   : > { %2308 = vmatpush1.bf16.msra.mxu0 %v5584_v6  ;;  %4418 = vmatprep.subr.msk.bf16.mxu1 %vm941_vm0, %v1229_v8  ;;  %v5619_v20 = vld.sshfl [vmem:[%s6994_s3 + $0x18] sm:$0x33 pattern:$0x76325410]  ;;  %vm447_vm3 = vsmask.f32 7440 }
  0x14   : > { %4530 = vmatprep.subr.msk.bf16.mxu0 %vm941_vm0, %v2585_v10  ;;  %s5607_s8 = scalar_lea.vmem %s6991_s0, %s5600_s30  ;;  %vm5640_vm4 = vmor %vm446_vm1, %vm447_vm3  ;;  %v2867_v43 = vcombine.high %v5619_v20, %v5619_v20  ;;  %vm1493_vm5 = vcmask 1042432   ;;  %vm1494_vm6 = vcmask 1046532   ;;  %s4675_s17 = sadd.s32 192, %s5600_s30 }
  0x15   : > { %v391_v12 = vld [vmem:[%s5607_s8] sm:$0xf]  ;;  %v392_v13 = vld [vmem:[%s5607_s8 + $0x4] sm:$0xf]  ;;  %v393_v14 = vld [vmem:[%s5607_s8 + $0x8] sm:$0x1]  ;;  %s363_s24 = scalar_lea.vmem %s6992_s1, %s4675_s17 }
  0x16   : > { %v450_v15 = vshrl.u32 %v391_v12, 16  ;;  %v453_v16 = vshll.u32 %v391_v12, 16  ;;  %v459_v17 = vshll.u32 %v392_v13, 16  ;;  %v463_v18 = vshrl.u32 %v392_v13, 16  ;;  %v5614_v19 = vld [vmem:[%s5607_s8 + $0xc] sm:$0xf]  ;;  %vm5826_vm7 = vmor %vm1493_vm5, %vm1494_vm6 }
  0x17   : > { %v469_v21 = vshll.u32 %v393_v14, 16  ;;  %v5622_v22 = vld [vmem:[%s5607_s8 + $0x10] sm:$0xf]  ;;  %v474_v23 = vshrl.u32 %v5614_v19, 16  ;;  %v5626_v28 = vld [vmem:[%s5607_s8 + $0x14] sm:$0x1] }
  0x18   : > { %v452_v24 = vrot.slane %v450_v15, 4  ;;  %v455_v25 = vrot.slane %v453_v16, 5  ;;  %v461_v26 = vrot.slane %v459_v17, 5  ;;  %v465_v27 = vrot.slane %v463_v18, 4  ;;  %v5633_v37 = vld [vmem:[%s5607_s8 + $0x18] sm:$0xf] }
  0x19   : > { %v471_v29 = vrot.slane %v469_v21, 5  ;;  %v476_v30 = vrot.slane %v474_v23, 4  ;;  %v477_v31 = vshll.u32 %v5614_v19, 16  ;;  %v483_v32 = vshll.u32 %v5622_v22, 16  ;;  %7027 = vst [vmem:[#allocation4_spill] sm:$0xff] %v5633_v37  ;;  %s4677_s27 = sadd.s32 204, %s5600_s30 }
  0x1a   : > { %v456_v33 = vor.u32 %v455_v25, %v452_v24  ;;  %v466_v34 = vor.u32 %v465_v27, %v461_v26  ;;  %v487_v35 = vshrl.u32 %v5622_v22, 16  ;;  %v493_v36 = vshll.u32 %v5626_v28, 16  ;;  %v5636_v38 = vld [vmem:[%s5607_s8 + $0x1c] sm:$0xf]  ;;  %v5648_v49 = vld [vmem:[%s5607_s8 + $0x20] sm:$0x1]  ;;  %s6497_s6 = scalar_lea.vmem %s6993_s2, %s4677_s27 }
  0x1b   : > { %7028 = vst [vmem:[#allocation5_spill] sm:$0xff] %v5636_v38  ;;  %v479_v40 = vrot.slane %v477_v31, 5  ;;  %v485_v41 = vrot.slane %v483_v32, 5  ;;  %v498_v50 = vshrl.u32 %v5633_v37, 16  ;;  %v501_v51 = vshll.u32 %v5633_v37, 16 }
  0x1c   : > { %v457_v44 = vrot.slane %v456_v33, 4  ;;  %v467_v45 = vrot.slane %v466_v34, 4  ;;  %v489_v46 = vrot.slane %v487_v35, 4  ;;  %v495_v47 = vrot.slane %v493_v36, 5  ;;  %v5659_v57 = vld [vmem:[%s5607_s8 + $0x24] sm:$0xf] }
  0x1d   : > { %v480_v48 = vor.u32 %v479_v40, %v476_v30  ;;  %v507_v52 = vshll.u32 %v5636_v38, 16  ;;  %v511_v56 = vshrl.u32 %v5636_v38, 16  ;;  %7031 = vst [vmem:[#allocation6_spill] sm:$0xff] %v5659_v57  ;;  %v500_v60 = vrot.slane %v498_v50, 4  ;;  %v5662_v62 = vld [vmem:[%s5607_s8 + $0x28] sm:$0xf] }
  0x1e   : > { %v462_v53 = vsel %vm5640_vm4, %v457_v44, %v461_v26  ;;  %v472_v54 = vsel %vm5640_vm4, %v467_v45, %v471_v29  ;;  %v490_v55 = vor.u32 %v489_v46, %v485_v41  ;;  %v503_v61 = vrot.slane %v501_v51, 5  ;;  %7032 = vst [vmem:[#allocation7_spill] sm:$0xff] %v5662_v62  ;;  %v5674_v14 = vld [vmem:[%s5607_s8 + $0x2c] sm:$0x1]  ;;  %v5678_v16 = vld [vmem:[%s5607_s8 + $0x30] sm:$0xf] }
  0x1f   : > { %v4367_v58 = vcombine.low %v462_v53, %v472_v54  ;;  %v481_v59 = vrot.slane %v480_v48, 4  ;;  %v509_v0 = vrot.slane %v507_v52, 5  ;;  %v513_v1 = vrot.slane %v511_v56, 4  ;;  %v5681_v24 = vld [vmem:[%s5607_s8 + $0x34] sm:$0xf] }
  0x20   : > { %v491_v63 = vrot.slane %v490_v55, 4  ;;  %v517_v2 = vshll.u32 %v5648_v49, 16  ;;  %v504_v7 = vor.u32 %v503_v61, %v500_v60  ;;  %v522_v8 = vshrl.u32 %v5659_v57, 16  ;;  %7033 = vst [vmem:[#allocation8_spill] sm:$0xff] %v5681_v24  ;;  %v5700_v44 = vld [vmem:[%s5607_s8 + $0x38] sm:$0x1] }
  0x21   : > { %4385 = vmatmul.mubr.msk.bf16.vlgmr.msra.gmra.mrb[0].mxu1 %vm892_vm2, %v4367_v58  ;;  %v486_v3 = vsel %vm5640_vm4, %v481_v59, %v485_v41  ;;  %v525_v9 = vshll.u32 %v5659_v57, 16  ;;  %v514_v12 = vor.u32 %v513_v1, %v509_v0  ;;  %v531_v15 = vshll.u32 %v5662_v62, 16  ;;  %v5704_v52 = vld [vmem:[%s5607_s8 + $0x3c] sm:$0xf] }
  0x22   : > { %1285 = vmatpush1.bf16.msra.mxu1 %v1279_v11  ;;  %v496_v10 = vsel %vm5640_vm4, %v491_v63, %v495_v47  ;;  %990 = vmatprep.mubr.bf16.mxu1 %v7003_v4  ;;  %v519_v13 = vrot.slane %v517_v2, 5  ;;  %v505_v18 = vrot.slane %v504_v7, 4  ;;  %v524_v21 = vrot.slane %v522_v8, 4  ;;  %v5726_v2 = vld [vmem:[%s5607_s8 + $0x44] sm:$0x1] }
  0x23   : > { %v4368_v17 = vcombine.low %v486_v3, %v496_v10  ;;  %v527_v23 = vrot.slane %v525_v9, 5  ;;  %v515_v11 = vrot.slane %v514_v12, 4  ;;  %v533_v25 = vrot.slane %v531_v15, 5  ;;  %v5733_v15 = vld [vmem:[%s5607_s8 + $0x4c] sm:$0xf] }
  0x24   : > { %v535_v26 = vshrl.u32 %v5662_v62, 16  ;;  %v541_v29 = vshll.u32 %v5674_v14, 16  ;;  %v546_v30 = vshrl.u32 %v5678_v16, 16  ;;  %v549_v31 = vshll.u32 %v5678_v16, 16 }
  0x25   : > { %4510 = vmatmul.mubr.msk.bf16.vlgmr.msra.gmra.mrb[0].mxu0 %vm892_vm2, %v4368_v17  ;;  %v528_v27 = vor.u32 %v527_v23, %v524_v21  ;;  %v510_v32 = vsel %vm5640_vm4, %v505_v18, %v509_v0  ;;  %v520_v33 = vsel %vm5640_vm4, %v515_v11, %v519_v13  ;;  %v555_v35 = vshll.u32 %v5681_v24, 16  ;;  %v5730_v13 = vld [vmem:[%s5607_s8 + $0x48] sm:$0xf] }
  0x26   : > { %2596 = vmatpush1.bf16.msra.mxu0 %v2590_v42  ;;  %2349 = vmatprep.mubr.bf16.mxu0 %v7003_v4  ;;  %v537_v34 = vrot.slane %v535_v26, 4  ;;  %v559_v40 = vshrl.u32 %v5681_v24, 16  ;;  %v5697_v41 = vcombine.low %v510_v32, %v520_v33  ;;  %v548_v45 = vrot.slane %v546_v30, 4  ;;  %v5748_v30 = vld [vmem:[%s5607_s8 + $0x54] sm:$0xf] }
  0x27   : > { %4550 = vmatprep.subr.msk.bf16.mxu0 %vm941_vm0, %v2867_v43  ;;  %v529_v42 = vrot.slane %v528_v27, 4  ;;  %v551_v46 = vrot.slane %v549_v31, 5  ;;  %v543_v48 = vrot.slane %v541_v29, 5  ;;  %v557_v50 = vrot.slane %v555_v35, 5  ;;  %v5707_v43 = vld [vmem:[%s5607_s8 + $0x40] sm:$0xf] }
  0x28   : > { %v538_v36 = vor.u32 %v537_v34, %v533_v25  ;;  %7034 = vst [vmem:[#allocation9_spill] sm:$0xff] %v5697_v41  ;;  %v561_v51 = vrot.slane %v559_v40, 4  ;;  %v565_v53 = vshll.u32 %v5700_v44, 16  ;;  %v570_v56 = vshrl.u32 %v5704_v52, 16  ;;  %v5755_v35 = vld [vmem:[%s5607_s8 + $0x58] sm:$0xf] }
  0x29   : > { %4386 = vmatmul.mubr.msk.bf16.gmra.mrb[4].mxu1 %vm892_vm2, %v4368_v17  ;;  %v534_v54 = vsel %vm5640_vm4, %v529_v42, %v533_v25  ;;  %v552_v55 = vor.u32 %v551_v46, %v548_v45  ;;  %v573_v58 = vshll.u32 %v5704_v52, 16  ;;  %v579_v61 = vshll.u32 %v5707_v43, 16  ;;  %v5759_v40 = vld [vmem:[%s5607_s8 + $0x50] sm:$0x1] }
  0x2a   : > { %1000 = vmatprep.mubr.bf16.mxu1 %v7003_v4  ;;  %v539_v47 = vrot.slane %v538_v36, 4  ;;  %v562_v60 = vor.u32 %v561_v51, %v557_v50  ;;  %v583_v63 = vshrl.u32 %v5707_v43, 16  ;;  %v572_v3 = vrot.slane %v570_v56, 4 }
  0x2b   : > { %v553_v1 = vrot.slane %v552_v55, 4  ;;  %v575_v7 = vrot.slane %v573_v58, 5  ;;  %v567_v9 = vrot.slane %v565_v53, 5  ;;  %v581_v10 = vrot.slane %v579_v61, 5 }
  0x2c   : > { %v544_v59 = vsel %vm5640_vm4, %v539_v47, %v543_v48  ;;  %v563_v8 = vrot.slane %v562_v60, 4  ;;  %v585_v12 = vrot.slane %v583_v63, 4  ;;  %v589_v17 = vshll.u32 %v5726_v2, 16 }
  0x2d   : > { %4511 = vmatmul.mubr.msk.bf16.gmra.mrb[4].mxu0 %vm892_vm2, %v5697_v41  ;;  %v5723_v0 = vcombine.low %v534_v54, %v544_v59  ;;  %v558_v18 = vsel %vm5640_vm4, %v553_v1, %v557_v50  ;;  %v576_v21 = vor.u32 %v575_v7, %v572_v3  ;;  %v594_v23 = vshrl.u32 %v5730_v13, 16  ;;  %v5774_v1 = vld [vmem:[%s5607_s8 + $0x60] sm:$0xf]  ;;  %v5781_v7 = vld [vmem:[%s5607_s8 + $0x5c] sm:$0x1] }
  0x2e   : > { %2359 = vmatprep.mubr.bf16.mxu0 %v7003_v4  ;;  %v597_v11 = vshll.u32 %v5730_v13, 16  ;;  %v568_v25 = vsel %vm5640_vm4, %v563_v8, %v567_v9  ;;  %v586_v26 = vor.u32 %v585_v12, %v581_v10  ;;  %v603_v27 = vshll.u32 %v5733_v15, 16  ;;  %7037 = vst [vmem:[#allocation12_spill] sm:$0xff] %v5774_v1  ;;  %v5785_v12 = vld [vmem:[%s5607_s8 + $0x64] sm:$0xf] }
  0x2f   : > { %7035 = vst [vmem:[#allocation10_spill] sm:$0xff] %v5723_v0  ;;  %v607_v29 = vshrl.u32 %v5733_v15, 16  ;;  %v5752_v31 = vcombine.low %v558_v18, %v568_v25  ;;  %v577_v32 = vrot.slane %v576_v21, 4  ;;  %v591_v33 = vrot.slane %v589_v17, 5  ;;  %7039 = vst [vmem:[#allocation14_spill] sm:$0xff] %v5785_v12 }
  0x30   : > { %v596_v34 = vrot.slane %v594_v23, 4  ;;  %v587_v36 = vrot.slane %v586_v26, 4  ;;  %v599_v42 = vrot.slane %v597_v11, 5  ;;  %v605_v45 = vrot.slane %v603_v27, 5 }
  0x31   : > { %4387 = vmatmul.mubr.msk.bf16.gmra.mrb[8].mxu1 %vm892_vm2, %v5697_v41  ;;  %7036 = vst [vmem:[#allocation11_spill] sm:$0xff] %v5752_v31  ;;  %v609_v46 = vrot.slane %v607_v29, 4  ;;  %v618_v47 = vshrl.u32 %v5748_v30, 16  ;;  %v621_v48 = vshll.u32 %v5748_v30, 16  ;;  %v627_v50 = vshll.u32 %v5755_v35, 16 }
  0x32   : > { %1010 = vmatprep.mubr.bf16.mxu1 %v7003_v4  ;;  %v631_v51 = vshrl.u32 %v5755_v35, 16  ;;  %v613_v53 = vshll.u32 %v5759_v40, 16  ;;  %v582_v54 = vsel %vm5640_vm4, %v577_v32, %v581_v10  ;;  %v592_v55 = vsel %vm5640_vm4, %v587_v36, %v591_v33 }
  0x33   : > { %v600_v56 = vor.u32 %v599_v42, %v596_v34  ;;  %v610_v58 = vor.u32 %v609_v46, %v605_v45  ;;  %v620_v59 = vrot.slane %v618_v47, 4  ;;  %v623_v60 = vrot.slane %v621_v48, 5  ;;  %v5805_v48 = vld [vmem:[%s5607_s8 + $0x68] sm:$0x1] }
  0x34   : > { %v629_v61 = vrot.slane %v627_v50, 5  ;;  %v633_v63 = vrot.slane %v631_v51, 4  ;;  %v5778_v3 = vcombine.low %v582_v54, %v592_v55  ;;  %v615_v10 = vrot.slane %v613_v53, 5  ;;  %7041 = vst [vmem:[#allocation16_spill] sm:$0xff] %v5805_v48  ;;  %v5811_v51 = vld [vmem:[%s5607_s8 + $0x6c] sm:$0xf] }
  0x35   : > { %4512 = vmatmul.mubr.msk.bf16.gmra.mrb[8].mxu0 %vm892_vm2, %v5723_v0  ;;  %v601_v8 = vrot.slane %v600_v56, 4  ;;  %v611_v9 = vrot.slane %v610_v58, 4  ;;  %v642_v17 = vshrl.u32 %v5774_v1, 16  ;;  %v645_v18 = vshll.u32 %v5774_v1, 16 }
  0x36   : > { %2369 = vmatprep.mubr.bf16.mxu0 %v7003_v4  ;;  %7038 = vst [vmem:[#allocation13_spill] sm:$0xff] %v5778_v3  ;;  %v624_v21 = vor.u32 %v623_v60, %v620_v59  ;;  %v634_v23 = vor.u32 %v633_v63, %v629_v61  ;;  %v637_v11 = vshll.u32 %v5781_v7, 16  ;;  %v651_v25 = vshll.u32 %v5785_v12, 16  ;;  %v5821_v59 = vld [vmem:[%s5607_s8 + $0x70] sm:$0xf] }
  0x37   : > { %v655_v26 = vshrl.u32 %v5785_v12, 16  ;;  %v606_v27 = vsel %vm5640_vm4, %v601_v8, %v605_v45  ;;  %v616_v29 = vsel %vm5640_vm4, %v611_v9, %v615_v10  ;;  %v644_v32 = vrot.slane %v642_v17, 4  ;;  %v5931_v12 = vld [vmem:[%s5607_s8 + $0x98] sm:$0x1] }
  0x38   : > { %v647_v33 = vrot.slane %v645_v18, 5  ;;  %v625_v34 = vrot.slane %v624_v21, 4  ;;  %v635_v36 = vrot.slane %v634_v23, 4  ;;  %v639_v42 = vrot.slane %v637_v11, 5  ;;  %v5839_v18 = vld [vmem:[%s5607_s8 + $0x7c] sm:$0xf] }
  0x39   : > { %4388 = vmatmul.mubr.msk.bf16.gmra.mrb[12].mxu1 %vm892_vm2, %v5723_v0  ;;  %v1505_v46 = vrot.slane %v5622_v22, 5  ;;  %v5802_v47 = vcombine.low %v606_v27, %v616_v29  ;;  %v5807_v45 = vrot.slane %v651_v25, 5  ;;  %v657_v50 = vrot.slane %v655_v26, 4  ;;  %v5850_v26 = vld [vmem:[%s5607_s8 + $0x74] sm:$0x1] }
  0x3a   : > { %1020 = vmatprep.mubr.bf16.mxu1 %v7003_v4  ;;  %v1508_v22 = vrot.slane %v5626_v28, 5  ;;  %v648_v53 = vor.u32 %v647_v33, %v644_v32  ;;  %v630_v54 = vsel %vm5640_vm4, %v625_v34, %v629_v61  ;;  %v640_v55 = vsel %vm5640_vm4, %v635_v36, %v639_v42  ;;  %v5853_v27 = vld [vmem:[%s5607_s8 + $0x84] sm:$0xf]  ;;  %v5860_v36 = vld [vmem:[%s5607_s8 + $0x88] sm:$0xf] }
  0x3b   : > { %7040 = vst [vmem:[#allocation15_spill] sm:$0xff] %v5802_v47  ;;  %v661_v56 = vshll.u32 %v5805_v48, 16  ;;  %v4436_v58 = vrot.slane %v5614_v19, 9  ;;  %v658_v28 = vor.u32 %v657_v50, %v5807_v45  ;;  %v1507_v61 = vrot.slane %v1505_v46, 4  ;;  %v5834_v19 = vld [vmem:[%s5607_s8 + $0x78] sm:$0xf] }
  0x3c   : > { %v666_v63 = vshrl.u32 %v5811_v51, 16  ;;  %v669_v8 = vshll.u32 %v5811_v51, 16  ;;  %v649_v9 = vrot.slane %v648_v53, 4  ;;  %v675_v10 = vshll.u32 %v5821_v59, 16 }
  0x3d   : > { %4513 = vmatmul.mubr.msk.bf16.gmra.mrb[12].mxu0 %vm892_vm2, %v5752_v31  ;;  %v679_v17 = vshrl.u32 %v5821_v59, 16  ;;  %v5841_v21 = vcombine.low %v630_v54, %v640_v55  ;;  %v663_v23 = vrot.slane %v661_v56, 5  ;;  %v1506_v11 = vsel %vm5826_vm7, %v4436_v58, %v1505_v46  ;;  %v5874_v56 = vld [vmem:[%s5607_s8 + $0x80] sm:$0x1] }
  0x3e   : > { %2379 = vmatprep.mubr.bf16.mxu0 %v7003_v4  ;;  %v5847_v25 = vsel %vm941_vm0, %v5619_v20, 0  ;;  %v659_v29 = vrot.slane %v658_v28, 4  ;;  %v1509_v32 = vsel %vm5826_vm7, %v1507_v61, %v1508_v22  ;;  %v668_v33 = vrot.slane %v666_v63, 4 }
  0x3f   : > { %7044 = vst [vmem:[#allocation17_spill] sm:$0xff] %v5841_v21  ;;  %v671_v34 = vrot.slane %v669_v8, 5  ;;  %v690_v20 = vshrl.u32 %v5834_v19, 16  ;;  %v693_v42 = vshll.u32 %v5834_v19, 16  ;;  %v699_v46 = vshll.u32 %v5839_v18, 16 }
  0x40   : > { %v703_v50 = vshrl.u32 %v5839_v18, 16  ;;  %v654_v53 = vsel %vm5640_vm4, %v649_v9, %v5807_v45  ;;  %v5870_v54 = vrot.slane %v675_v10, 5  ;;  %v681_v22 = vrot.slane %v679_v17, 4 }
  0x41   : > { %4389 = vmatmul.mubr.msk.bf16.gmra.mrb[16].mxu1 %vm892_vm2, %v5752_v31  ;;  %v685_v55 = vshll.u32 %v5850_v26, 16  ;;  %v714_v58 = vshrl.u32 %v5853_v27, 16  ;;  %v717_v28 = vshll.u32 %v5853_v27, 16  ;;  %v723_v61 = vshll.u32 %v5860_v36, 16 }
  0x42   : > { %1030 = vmatprep.mubr.bf16.mxu1 %v7003_v4  ;;  %v727_v63 = vshrl.u32 %v5860_v36, 16  ;;  %v664_v45 = vsel %vm5640_vm4, %v659_v29, %v663_v23  ;;  %v672_v8 = vor.u32 %v671_v34, %v668_v33  ;;  %v4437_v9 = vrot.slane %v5633_v37, 9 }
  0x43   : > { %v1512_v10 = vrot.slane %v5636_v38, 5  ;;  %v692_v17 = vrot.slane %v690_v20, 4  ;;  %v695_v6 = vrot.slane %v693_v42, 5  ;;  %v5889_v31 = vcombine.low %v1506_v11, %v1509_v32  ;;  %v5897_v20 = vld [vmem:[%s5607_s8 + $0x90] sm:$0xf] }
  0x44   : > { %v682_v0 = vor.u32 %v681_v22, %v5870_v54  ;;  %v1515_v23 = vrot.slane %v5648_v49, 5  ;;  %v709_v29 = vshll.u32 %v5874_v56, 16  ;;  %v716_v33 = vrot.slane %v714_v58, 4 }
  0x45   : > { %4514 = vmatmul.mubr.msk.bf16.gmra.mrb[16].mxu0 %vm892_vm2, %v5778_v3  ;;  %v719_v34 = vrot.slane %v717_v28, 5  ;;  %v5894_v41 = vrot.slane %v723_v61, 5  ;;  %v5901_v42 = vcombine.low %v654_v53, %v664_v45  ;;  %v687_v11 = vrot.slane %v685_v55, 5 }
  0x46   : > { %2389 = vmatprep.mubr.bf16.mxu0 %v7003_v4  ;;  %v1513_v32 = vsel %vm5826_vm7, %v4437_v9, %v1512_v10  ;;  %v1514_v49 = vrot.slane %v1512_v10, 4  ;;  %v673_v22 = vrot.slane %v672_v8, 4  ;;  %v696_v58 = vor.u32 %v695_v6, %v692_v17 }
  0x47   : > { %7045 = vst [vmem:[#allocation18_spill] sm:$0xff] %v5901_v42  ;;  %v1519_v61 = vrot.slane %v5662_v62, 5  ;;  %v1526_v53 = vrot.slane %v5681_v24, 5  ;;  %v738_v55 = vshrl.u32 %v5897_v20, 16  ;;  %v741_v45 = vshll.u32 %v5897_v20, 16 }
  0x48   : > { %v711_v9 = vrot.slane %v709_v29, 5  ;;  %v720_v10 = vor.u32 %v719_v34, %v716_v33  ;;  %v4438_v6 = vrot.slane %v5659_v57, 9  ;;  %v697_v29 = vrot.slane %v696_v58, 4 }
  0x49   : > { %4390 = vmatmul.mubr.msk.bf16.gmra.mrb[20].mxu1 %vm892_vm2, %v5778_v3  ;;  %v705_v3 = vrot.slane %v703_v50, 4  ;;  %v7046_v50 = vmov 0   ;;  %v1521_v34 = vrot.slane %v1519_v61, 4  ;;  %v1528_v24 = vrot.slane %v1526_v53, 4 }
  0x4a   : > { %1040 = vmatprep.mubr.bf16.mxu1 %v7003_v4  ;;  %v1529_v62 = vrot.slane %v5700_v44, 5  ;;  %v740_v37 = vrot.slane %v738_v55, 4  ;;  %v743_v38 = vrot.slane %v741_v45, 5  ;;  %v721_v57 = vrot.slane %v720_v10, 4 }
  0x4b   : > { %v678_v58 = vsel %vm5640_vm4, %v673_v22, %v5870_v54  ;;  %v757_v45 = vshll.u32 %v5931_v12, 16 }
  0x4c   : > { %v744_v22 = vor.u32 %v743_v38, %v740_v37 }
  0x4d   : > { %4515 = vmatmul.mubr.msk.bf16.gmra.mrb[20].mxu0 %vm892_vm2, %v5802_v47 }
  0x4e   : > { %2399 = vmatprep.mubr.bf16.mxu0 %v7003_v4 }
  0x51   : > { %4391 = vmatmul.mubr.msk.bf16.gmra.mrb[24].mxu1 %vm892_vm2, %v5802_v47  ;;  %v5887_v47 = vrot.slane %v699_v46, 5  ;;  %v5906_v46 = vld [vmem:[%s5607_s8 + $0x8c] sm:$0x1] }
  0x52   : > { %1050 = vmatprep.mubr.bf16.mxu1 %v7003_v4  ;;  %v733_v8 = vshll.u32 %v5906_v46, 16 }
  0x53   : > { %v706_v28 = vor.u32 %v705_v3, %v5887_v47  ;;  %v1522_v3 = vrot.slane %v5674_v14, 5  ;;  %v1516_v14 = vsel %vm5826_vm7, %v1514_v49, %v1515_v23  ;;  %v1520_v49 = vsel %vm5826_vm7, %v4438_v6, %v1519_v61 }
  0x54   : > { %v735_v1 = vrot.slane %v733_v8, 5  ;;  %v726_v61 = vsel %vm5640_vm4, %v721_v57, %v5894_v41  ;;  %v5991_v8 = vrot.slane %v744_v22, 4  ;;  %v5993_v6 = vrot.slane %v757_v45, 5 }
  0x55   : > { %4516 = vmatmul.mubr.msk.bf16.gmra.mrb[24].mxu0 %vm892_vm2, %v5841_v21  ;;  %v707_v33 = vrot.slane %v706_v28, 4  ;;  %v1523_v54 = vsel %vm5826_vm7, %v1521_v34, %v1522_v3  ;;  %v5996_v3 = vld [vmem:[%s5607_s8 + $0xa0] sm:$0xf]  ;;  %v4446_v45 = vrot.slane %v5853_v27, 9 }
  0x56   : > { %2409 = vmatprep.mubr.bf16.mxu0 %v7003_v4  ;;  %v729_v4 = vrot.slane %v727_v63, 4  ;;  %v5912_v63 = vld [vmem:[%s5607_s8 + $0x94] sm:$0xf] }
  0x57   : > { %v751_v17 = vshrl.u32 %v5912_v63, 16  ;;  %v712_v23 = vsel %vm5640_vm4, %v707_v33, %v711_v9  ;;  %v5962_v9 = vcombine.low %v1513_v32, %v1516_v14  ;;  %v5979_v32 = vld [vmem:[%s5607_s8 + $0x9c] sm:$0xf]  ;;  %v1564_v33 = vrot.slane %v5850_v26, 5 }
  0x58   : > { %v730_v5 = vor.u32 %v729_v4, %v5894_v41  ;;  %v4439_v4 = vrot.slane %v5678_v16, 9  ;;  %v4445_v14 = vrot.slane %v5834_v19, 9 }
  0x59   : > { %4392 = vmatmul.mubr.msk.bf16.gmra.mrb[28].mxu1 %vm892_vm2, %v5841_v21  ;;  %v683_v21 = vrot.slane %v682_v0, 4  ;;  %v747_v0 = vshll.u32 %v5912_v63, 16  ;;  %v753_v55 = vrot.slane %v751_v17, 4  ;;  %7047 = vst [vmem:[#allocation19_spill] sm:$0xff] %v5962_v9  ;;  %v762_v17 = vshrl.u32 %v5979_v32, 16 }
  0x5a   : > { %1060 = vmatprep.mubr.bf16.mxu1 %v7046_v50  ;;  %v731_v48 = vrot.slane %v730_v5, 4  ;;  %v702_v5 = vsel %vm5640_vm4, %v697_v29, %v5887_v47  ;;  %v5960_v47 = vld.sshfl [vmem:[%s6994_s3 + $0x8] sm:$0x33 pattern:$0x76325410]  ;;  %v1561_v29 = vrot.slane %v5821_v59, 5 }
  0x5b   : > { %v688_v44 = vsel %vm5640_vm4, %v683_v21, %v687_v11  ;;  %v5940_v28 = vrot.slane %v747_v0, 5  ;;  %v1527_v21 = vsel %vm5826_vm7, %v4439_v4, %v1526_v53  ;;  %v1530_v11 = vsel %vm5826_vm7, %v1528_v24, %v1529_v62 }
  0x5c   : > { %v736_v53 = vsel %vm5640_vm4, %v731_v48, %v735_v1  ;;  %v5971_v37 = vcombine.low %v678_v58, %v688_v44  ;;  %v5973_v38 = vcombine.low %v702_v5, %v712_v23  ;;  %v5975_v62 = vcombine.low %v1520_v49, %v1523_v54 }
  0x5d   : > { %4517 = vmatmul.mubr.msk.bf16.gmra.mrb[28].mxu0 %vm892_vm2, %v5901_v42  ;;  %v754_v24 = vor.u32 %v753_v55, %v5940_v28  ;;  %v5983_v57 = vcombine.low %v1527_v21, %v1530_v11  ;;  %v7017_v1 = vrot.slane %v5707_v43, 5  ;;  %v1666_v48 = vcombine.high %v5960_v47, %v5960_v47 }
  0x5e   : > { %2627 = vmatprep.mubr.bf16.mxu0 %v7046_v50  ;;  %7048 = vst [vmem:[#allocation20_spill] sm:$0xff] %v5971_v37  ;;  %7049 = vst [vmem:[#allocation21_spill] sm:$0xff] %v5973_v38  ;;  %v5989_v10 = vcombine.low %v726_v61, %v736_v53  ;;  %v765_v4 = vshll.u32 %v5979_v32, 16  ;;  %v1568_v58 = vrot.slane %v5839_v18, 5  ;;  %v771_v55 = vshll.u32 %v5996_v3, 16 }
  0x5f   : > { %4469 = vmatprep.subr.msk.bf16.mxu1 %vm941_vm0, %v1666_v48  ;;  %v6006_v34 = vrot.slane %v754_v24, 4  ;;  %v6014_v44 = vrot.slane %v7017_v1, 4  ;;  %v1563_v5 = vrot.slane %v1561_v29, 4  ;;  %v1571_v21 = vrot.slane %v5874_v56, 5 }
  0x60   : > { %v1569_v49 = vsel %vm5826_vm7, %v4445_v14, %v1568_v58  ;;  %v1570_v54 = vrot.slane %v1568_v58, 4  ;;  %v6026_v11 = vrot.slane %v762_v17, 4  ;;  %v1575_v61 = vrot.slane %v5860_v36, 5  ;;  %v6052_v58 = vld [vmem:[%s5607_s8 + $0xa8] sm:$0xf] }
  0x61   : > { %4393 = vmatmul.mubr.msk.bf16.gmra.mrb[32].mxu1 %vm892_vm2, %v5901_v42  ;;  %v1565_v22 = vsel %vm5826_vm7, %v1563_v5, %v1564_v33  ;;  %v6034_v53 = vrot.slane %v765_v4, 5  ;;  %v1578_v48 = vrot.slane %v5906_v46, 5  ;;  %v4447_v4 = vrot.slane %v5897_v20, 9 }
  0x62   : > { %1070 = vmatprep.mubr.bf16.mxu1 %v7046_v50  ;;  %v1572_v56 = vsel %vm5826_vm7, %v1570_v54, %v1571_v21  ;;  %v1577_v33 = vrot.slane %v1575_v61, 4  ;;  %v775_v14 = vshrl.u32 %v5996_v3, 16  ;;  %v1582_v46 = vrot.slane %v5912_v63, 5  ;;  %v6060_v54 = vld [vmem:[%s5607_s8 + $0xac] sm:$0xf] }
  0x63   : > { %v6045_v17 = vcombine.low %v1569_v49, %v1572_v56  ;;  %v4448_v5 = vrot.slane %v5979_v32, 9  ;;  %v6057_v49 = vrot.slane %v771_v55, 5  ;;  %v1596_v23 = vrot.slane %v6060_v54, 5 }
  0x64   : > { %v1579_v21 = vsel %vm5826_vm7, %v1577_v33, %v1578_v48  ;;  %v1583_v55 = vsel %vm5826_vm7, %v4447_v4, %v1582_v46  ;;  %v1584_v0 = vrot.slane %v1582_v46, 4  ;;  %v4449_v48 = vrot.slane %v6052_v58, 9  ;;  %v6081_v33 = vld [vmem:[%s5607_s8 + $0xb8] sm:$0xf] }
  0x65   : > { %4531 = vmatmul.mubr.msk.bf16.vlgmr.msra.gmra.mrb[0].mxu0 %vm892_vm2, %v5889_v31 }
  0x66   : > { %2878 = vmatpush1.bf16.msra.mxu0 %v5847_v25  ;;  %2637 = vmatprep.mubr.bf16.mxu0 %v7046_v50  ;;  %v4444_v25 = vrot.slane %v5811_v51, 9 }
  0x68   : > { %v1562_v26 = vsel %vm5826_vm7, %v4444_v25, %v1561_v29  ;;  %v6043_v25 = vld [vmem:[%s5607_s8 + $0xa4] sm:$0x1]  ;;  %v1576_v29 = vsel %vm5826_vm7, %v4446_v45, %v1575_v61  ;;  %v6069_v61 = vld [vmem:[%s5607_s8 + $0xb0] sm:$0x1] }
  0x69   : > { %4394 = vmatmul.mubr.msk.bf16.gmra.mrb[36].mxu1 %vm892_vm2, %v5971_v37  ;;  %v6036_v24 = vcombine.low %v1562_v26, %v1565_v22  ;;  %v1585_v26 = vrot.slane %v5931_v12, 5  ;;  %v1589_v22 = vrot.slane %v5996_v3, 5  ;;  %v1592_v45 = vrot.slane %v6043_v25, 5  ;;  %v6072_v12 = vld [vmem:[%s5607_s8 + $0xb4] sm:$0xf] }
  0x6a   : > { %1080 = vmatprep.mubr.bf16.mxu1 %v7046_v50  ;;  %v6074_v56 = vcombine.low %v1576_v29, %v1579_v21  ;;  %v777_v29 = vrot.slane %v775_v14, 4  ;;  %v6088_v21 = vld [vmem:[%s5607_s8 + $0xbc] sm:$0x1]  ;;  %v4450_v46 = vrot.slane %v6072_v12, 9  ;;  %v1603_v37 = vrot.slane %v6081_v33, 5 }
  0x6b   : > { %v1590_v41 = vsel %vm5826_vm7, %v4448_v5, %v1589_v22  ;;  %v1591_v1 = vrot.slane %v1589_v22, 4  ;;  %v1586_v4 = vsel %vm5826_vm7, %v1584_v0, %v1585_v26  ;;  %v1597_v22 = vsel %vm5826_vm7, %v4449_v48, %v1596_v23  ;;  %v6103_v14 = vld.sshfl [vmem:[%s6994_s3 + $0x1c] sm:$0x33 pattern:$0x76325410] }
  0x6c   : > { %v6094_v42 = vcombine.low %v1583_v55, %v1586_v4  ;;  %v1604_v26 = vsel %vm5826_vm7, %v4450_v46, %v1603_v37  ;;  %v1605_v55 = vrot.slane %v1603_v37, 4  ;;  %v781_v48 = vshll.u32 %v6043_v25, 16 }
  0x6d   : > { %4532 = vmatmul.mubr.msk.bf16.gmra.mrb[4].mxu0 %vm892_vm2, %v5962_v9  ;;  %v1593_v5 = vsel %vm5826_vm7, %v1591_v1, %v1592_v45  ;;  %v1598_v9 = vrot.slane %v1596_v23, 4  ;;  %v1606_v1 = vrot.slane %v6088_v21, 5  ;;  %v760_v23 = vsel %vm5640_vm4, %v6006_v34, %v5993_v6 }
  0x6e   : > { %2647 = vmatprep.mubr.bf16.mxu0 %v7046_v50  ;;  %v6107_v0 = vcombine.low %v1590_v41, %v1593_v5  ;;  %v768_v45 = vor.u32 %v6034_v53, %v6026_v11  ;;  %v778_v4 = vor.u32 %v777_v29, %v6057_v49  ;;  %v3171_v5 = vcombine.high %v6103_v14, %v6103_v14 }
  0x6f   : > { %v1607_v46 = vsel %vm5826_vm7, %v1605_v55, %v1606_v1  ;;  %v786_v6 = vshrl.u32 %v6052_v58, 16  ;;  %v789_v34 = vshll.u32 %v6052_v58, 16  ;;  %v795_v11 = vshll.u32 %v6060_v54, 16 }
  0x70   : > { %v6132_v53 = vcombine.low %v1604_v26, %v1607_v46  ;;  %4570 = vmatprep.subr.msk.bf16.mxu0 %vm941_vm0, %v3171_v5  ;;  %v6144_v25 = vcombine.low %v5834_v19, %v5839_v18  ;;  %v6148_v29 = vcombine.low %v5853_v27, %v5860_v36  ;;  %v7053_v18 = vrot.slane %v5726_v2, 5 }
  0x71   : > { %4395 = vmatmul.mubr.msk.bf16.gmra.mrb[40].mxu1 %vm892_vm2, %v5973_v38  ;;  %v1599_v38 = vrot.slane %v6069_v61, 5  ;;  %v769_v36 = vrot.slane %v768_v45, 4  ;;  %v779_v55 = vrot.slane %v778_v4, 4  ;;  %v783_v1 = vrot.slane %v781_v48, 5 }
  0x72   : > { %1090 = vmatprep.mubr.bf16.mxu1 %v7046_v50  ;;  %v1537_v27 = vsel %vm5826_vm7, %v6014_v44, %v7053_v18  ;;  %v6175_v2 = vcombine.low %v5897_v20, %v5912_v63  ;;  %v4441_v44 = vrot.slane %v5730_v13, 9  ;;  %v1543_v4 = vrot.slane %v5759_v40, 5 }
  0x73   : > { %v1600_v41 = vsel %vm5826_vm7, %v1598_v9, %v1599_v38  ;;  %v799_v9 = vshrl.u32 %v6060_v54, 16  ;;  %v6140_v38 = vcombine.low %v5811_v51, %v5821_v59  ;;  %v7051_v51 = vrot.slane %v5707_v43, 5 }
  0x74   : > { %v6123_v37 = vcombine.low %v1597_v22, %v1600_v41  ;;  %v7050_v22 = vsel %vm5640_vm4, %v5991_v8, %v5940_v28  ;;  %v7052_v59 = vrot.slane %v5704_v52, 9  ;;  %v1540_v28 = vrot.slane %v5733_v15, 5 }
  0x75   : > { %4533 = vmatmul.mubr.msk.bf16.gmra.mrb[8].mxu0 %vm892_vm2, %v5975_v62  ;;  %v6156_v26 = vcombine.low %v7050_v22, %v760_v23  ;;  %v788_v8 = vrot.slane %v786_v6, 4  ;;  %v791_v23 = vrot.slane %v789_v34, 5  ;;  %v797_v41 = vrot.slane %v795_v11, 5 }
  0x76   : > { %2657 = vmatprep.mubr.bf16.mxu0 %v7046_v50  ;;  %v1534_v19 = vsel %vm5826_vm7, %v7052_v59, %v7051_v51  ;;  %v801_v46 = vrot.slane %v799_v9, 4  ;;  %v774_v45 = vsel %vm5640_vm4, %v769_v36, %v6057_v49  ;;  %v1542_v48 = vrot.slane %v1540_v28, 4 }
  0x77   : > { %v6177_v5 = vcombine.low %v1534_v19, %v1537_v27  ;;  %v805_v6 = vshll.u32 %v6069_v61, 16  ;;  %v784_v20 = vsel %vm5640_vm4, %v779_v55, %v783_v1  ;;  %v792_v63 = vor.u32 %v791_v23, %v788_v8 }
  0x78   : > { %v802_v34 = vor.u32 %v801_v46, %v797_v41  ;;  %v810_v11 = vshrl.u32 %v6072_v12, 16  ;;  %v813_v9 = vshll.u32 %v6072_v12, 16  ;;  %v819_v49 = vshll.u32 %v6081_v33, 16 }
  0x79   : > { %4396 = vmatmul.mubr.msk.bf16.gmra.mrb[44].mxu1 %vm892_vm2, %v5989_v10  ;;  %v823_v40 = vshrl.u32 %v6081_v33, 16  ;;  %v6194_v22 = vcombine.low %v774_v45, %v784_v20  ;;  %v1541_v61 = vsel %vm5826_vm7, %v4441_v44, %v1540_v28  ;;  %v1544_v51 = vsel %vm5826_vm7, %v1542_v48, %v1543_v4 }
  0x7a   : > { %1100 = vmatprep.mubr.bf16.mxu1 %v7046_v50  ;;  %v807_v59 = vrot.slane %v805_v6, 5  ;;  %v793_v19 = vrot.slane %v792_v63, 4  ;;  %v803_v18 = vrot.slane %v802_v34, 4  ;;  %v1547_v27 = vrot.slane %v5755_v35, 5 }
  0x7b   : > { %v812_v36 = vrot.slane %v810_v11, 4  ;;  %v815_v55 = vrot.slane %v813_v9, 5  ;;  %v821_v1 = vrot.slane %v819_v49, 5  ;;  %v825_v8 = vrot.slane %v823_v40, 4  ;;  %v7054_v11 = vld [vmem:[#allocation14_spill] sm:$0xff] }
  0x7c   : > { %v6206_v28 = vcombine.low %v5979_v32, %v5996_v3  ;;  %v6208_v23 = vcombine.low %v1541_v61, %v1544_v51  ;;  %v4442_v46 = vrot.slane %v5748_v30, 9  ;;  %v1549_v44 = vrot.slane %v1547_v27, 4  ;;  %v7055_v61 = vld [vmem:[#allocation12_spill] sm:$0xff] }
  0x7d   : > { %4534 = vmatmul.mubr.msk.bf16.gmra.mrb[12].mxu0 %vm892_vm2, %v5983_v57  ;;  %v1550_v45 = vrot.slane %v5781_v7, 5  ;;  %v829_v48 = vshll.u32 %v6088_v21, 16  ;;  %v798_v4 = vsel %vm5640_vm4, %v793_v19, %v797_v41  ;;  %v808_v32 = vsel %vm5640_vm4, %v803_v18, %v807_v59 }
  0x7e   : > { %2667 = vmatprep.mubr.bf16.mxu0 %v7046_v50  ;;  %v816_v3 = vor.u32 %v815_v55, %v812_v36  ;;  %v826_v6 = vor.u32 %v825_v8, %v821_v1  ;;  %v6222_v20 = vcombine.low %v798_v4, %v808_v32  ;;  %v1548_v7 = vsel %vm5826_vm7, %v4442_v46, %v1547_v27  ;;  %v6266_v46 = vld [vmem:[%s5607_s8] sm:$0xf]  ;;  %v5496_v4 = vld [vmem:[%s5607_s8 + $0xc] sm:$0xf]  ;;  %v5497_v32 = vld [vmem:[%s5607_s8 + $0x10] sm:$0xf] }
  0x7f   : > { %v1551_v21 = vsel %vm5826_vm7, %v1549_v44, %v1550_v45  ;;  %v831_v63 = vrot.slane %v829_v48, 5  ;;  %v1554_v9 = vrot.slane %v7054_v11, 5  ;;  %v6232_v49 = vcombine.low %v6052_v58, %v6060_v54  ;;  %v7056_v58 = vld [vmem:[#allocation16_spill] sm:$0xff]  ;;  %v6269_v44 = vld [vmem:[%s5607_s8 + $0x4] sm:$0xf] }
  0x80   : > { %v817_v41 = vrot.slane %v816_v3, 4  ;;  %v827_v34 = vrot.slane %v826_v6, 4  ;;  %v6236_v40 = vcombine.low %v1548_v7, %v1551_v21  ;;  %v4443_v51 = vrot.slane %v7055_v61, 9  ;;  %v7058_v6 = vld [vmem:[#allocation4_spill] sm:$0xff]  ;;  %v7059_v21 = vld [vmem:[#allocation7_spill] sm:$0xff] }
  0x81   : > { %4397 = vmatmul.mubr.msk.bf16.gmra.mrb[48].mxu1 %vm892_vm2, %v6156_v26  ;;  %v1556_v18 = vrot.slane %v1554_v9, 4  ;;  %v1557_v54 = vrot.slane %v7056_v58, 5  ;;  %v1716_v45 = vsel %vm941_vm0, %v5960_v47, 0  ;;  %v6290_v3 = vcombine.low %v5496_v4, %v5497_v32  ;;  %v7057_v47 = vld [vmem:[#allocation5_spill] sm:$0xff] }
  0x82   : > { %1110 = vmatprep.mubr.bf16.mxu1 %v7046_v50  ;;  %v822_v59 = vsel %vm5640_vm4, %v817_v41, %v821_v1  ;;  %v832_v19 = vsel %vm5640_vm4, %v827_v34, %v831_v63  ;;  %v1555_v36 = vsel %vm5826_vm7, %v4443_v51, %v1554_v9  ;;  %v6256_v1 = vcombine.low %v6072_v12, %v6081_v33  ;;  %v6276_v33 = vld.sshfl [vmem:[%s6994_s3 + $0xc] sm:$0x33 pattern:$0x76325410]  ;;  %v7060_v63 = vld [vmem:[#allocation6_spill] sm:$0xff]  ;;  %v7061_v34 = vld [vmem:[#allocation8_spill] sm:$0xff] }
  0x83   : > { %v6247_v27 = vcombine.low %v822_v59, %v832_v19  ;;  %v1558_v55 = vsel %vm5826_vm7, %v1556_v18, %v1557_v54  ;;  %v4401_v12 = vcombine.low %v6266_v46, %v6269_v44  ;;  %v1993_v48 = vcombine.high %v6276_v33, %v6276_v33  ;;  %v6350_v59 = vld [vmem:[%s363_s24] sm:$0xf]  ;;  %v6352_v19 = vld [vmem:[%s363_s24 + $0x8] sm:$0x1] }
  0x84   : > { %v6260_v8 = vcombine.low %v1555_v36, %v1558_v55  ;;  %v6300_v7 = vcombine.low %v7058_v6, %v7057_v47  ;;  %v6310_v41 = vcombine.low %v7060_v63, %v7059_v21  ;;  %v6320_v9 = vcombine.low %v5678_v16, %v7061_v34  ;;  %v6340_v16 = vld [vmem:[%s363_s24 + $0x4] sm:$0xf]  ;;  %v6503_v21 = vld [vmem:[%s6497_s6] sm:$0xf] }
  0x85   : > { %4535 = vmatmul.mubr.msk.bf16.gmra.mrb[16].mxu0 %vm892_vm2, %v6177_v5  ;;  %v6330_v51 = vcombine.low %v5704_v52, %v5707_v43  ;;  %v6346_v52 = vcombine.low %v5730_v13, %v5733_v15  ;;  %v2567_v43 = vrot.slane %v6340_v16, 5  ;;  %v4526_v18 = vrot.slane %v6350_v59, 9  ;;  %v7062_v6 = vld [vmem:[#allocation2_spill] sm:$0xff] }
  0x86   : > { %2677 = vmatprep.mubr.bf16.mxu0 %v7046_v50  ;;  %v2570_v54 = vrot.slane %v6352_v19, 5  ;;  %v6363_v13 = vcombine.low %v5748_v30, %v5755_v35  ;;  %v6379_v30 = vcombine.low %v7055_v61, %v7054_v11  ;;  %v6385_v35 = vld.sshfl [vmem:[%s6994_s3 + $0x20] sm:$0x33 pattern:$0x76325410] }
  0x87   : > { %v2569_v58 = vrot.slane %v2567_v43, 4  ;;  %v2568_v15 = vsel %vm5826_vm7, %v4526_v18, %v2567_v43  ;;  %v5498_v11 = vld [vmem:[%s5607_s8 + $0x8] sm:$0x1]  ;;  %v6506_v63 = vld [vmem:[%s6497_s6 + $0x4] sm:$0xf]  ;;  %v3464_v43 = vsel %vm941_vm0, %v6385_v35, 0 }
  0x88   : > { %v1501_v61 = vrot.slane %v5498_v11, 5  ;;  %v4548_v34 = vcombine.low %v6503_v21, %v6506_v63  ;;  %v7064_v18 = vld [vmem:[#allocation9_spill] sm:$0xff]  ;;  %v3441_v39 = vrot.slane %v6506_v63, 5  ;;  %s4678_s8 = sshll.u32 %s7079_s18, 7 }
  0x89   : > { %4398 = vmatmul.mubr.msk.bf16.gmra.mrb[52].mxu1 %vm892_vm2, %v6194_v22  ;;  %v2571_v36 = vsel %vm5826_vm7, %v2569_v58, %v2570_v54  ;;  %v7065_v58 = vld [vmem:[#allocation10_spill] sm:$0xff]  ;;  %v7066_v54 = vld [vmem:[#allocation11_spill] sm:$0xff]  ;;  %v7073_v11 = vld [vmem:[#allocation21_spill] sm:$0xff]  ;;  %s6825_s18 = scalar_lea.vmem %s6996_s5, %s4678_s8 }
  0x8a   : > { %1120 = vmatprep.mubr.bf16.mxu1 %v7046_v50  ;;  %v6372_v55 = vcombine.low %v2568_v15, %v2571_v36  ;;  %v7067_v15 = vld [vmem:[#allocation13_spill] sm:$0xff]  ;;  %v7068_v36 = vld [vmem:[#allocation15_spill] sm:$0xff] }
  0x8d   : > { %4536 = vmatmul.mubr.msk.bf16.gmra.mrb[20].mxu0 %vm892_vm2, %v6208_v23 }
  0x8e   : > { %2687 = vmatprep.mubr.bf16.mxu0 %v7046_v50 }
  0x91   : > { %4399 = vmatmul.mubr.msk.bf16.gmra.mrb[56].mxu1 %vm892_vm2, %v6222_v20 }
  0x92   : > { %1130 = vmatprep.mubr.bf16.mxu1 %v7046_v50 }
  0x95   : > { %4537 = vmatmul.mubr.msk.bf16.gmra.mrb[24].mxu0 %vm892_vm2, %v6236_v40 }
  0x96   : > { %2697 = vmatprep.mubr.bf16.mxu0 %v7046_v50 }
  0x99   : > { %4400 = vmatmul.mubr.msk.bf16.gmra.mrb[60].mxu1 %vm892_vm2, %v6247_v27 }
  0x9a   : > { %1316 = vmatprep.mubr.bf16.mxu1 %v7046_v50 }
  0x9d   : > { %4538 = vmatmul.mubr.msk.bf16.gmra.mrb[28].mxu0 %vm892_vm2, %v6260_v8 }
  0x9e   : > { %2707 = vmatprep.mubr.bf16.mxu0 %v7046_v50 }
  0xa1   : > { %4419 = vmatmul.mubr.msk.bf16.vlgmr.msra.gmra.mrb[0].mxu1 %vm892_vm2, %v4401_v12  ;;  %v3176_v12 = vsel %vm941_vm0, %v6103_v14, 0  ;;  %v1498_v14 = vrot.slane %v6269_v44, 5 }
  0xa2   : > { %1722 = vmatpush1.bf16.msra.mxu1 %v1716_v45  ;;  %1326 = vmatprep.mubr.bf16.mxu1 %v7046_v50  ;;  %v3459_v45 = vcombine.high %v6385_v35, %v6385_v35  ;;  %v7069_v35 = vld [vmem:[#allocation17_spill] sm:$0xff] }
  0xa3   : > { %4489 = vmatprep.subr.msk.bf16.mxu1 %vm941_vm0, %v1993_v48  ;;  %v4435_v48 = vrot.slane %v6266_v46, 9  ;;  %v1500_v4 = vrot.slane %v1498_v14, 4  ;;  %v1998_v46 = vsel %vm941_vm0, %v6276_v33, 0  ;;  %v7063_v33 = vld [vmem:[#allocation19_spill] sm:$0xff] }
  0xa5   : > { %4539 = vmatmul.mubr.msk.bf16.gmra.mrb[32].mxu0 %vm892_vm2, %v6036_v24  ;;  %v1499_v44 = vsel %vm5826_vm7, %v4435_v48, %v1498_v14  ;;  %v1502_v32 = vsel %vm5826_vm7, %v1500_v4, %v1501_v61  ;;  %v7072_v14 = vld [vmem:[#allocation3_spill] sm:$0xff]  ;;  %v2274_v61 = vshrl.u32 %v6340_v16, 16 }
  0xa6   : > { %2717 = vmatprep.mubr.bf16.mxu0 %v7046_v50  ;;  %v4452_v47 = vcombine.low %v1499_v44, %v1502_v32 }
  0xa7   : > { %v2276_v44 = vrot.slane %v2274_v61, 4 }
  0xa9   : > { %4420 = vmatmul.mubr.msk.bf16.gmra.mrb[4].mxu1 %vm892_vm2, %v6290_v3 }
  0xaa   : > { %1336 = vmatprep.mubr.bf16.mxu1 %v7046_v50 }
  0xad   : > { %4540 = vmatmul.mubr.msk.bf16.gmra.mrb[36].mxu0 %vm892_vm2, %v6045_v17 }
  0xae   : > { %2727 = vmatprep.mubr.bf16.mxu0 %v7046_v50 }
  0xb1   : > { %4421 = vmatmul.mubr.msk.bf16.gmra.mrb[8].mxu1 %vm892_vm2, %v6300_v7 }
  0xb2   : > { %1346 = vmatprep.mubr.bf16.mxu1 %v7046_v50 }
  0xb5   : > { %4541 = vmatmul.mubr.msk.bf16.gmra.mrb[40].mxu0 %vm892_vm2, %v6074_v56 }
  0xb6   : > { %2737 = vmatprep.mubr.bf16.mxu0 %v7046_v50 }
  0xb9   : > { %4422 = vmatmul.mubr.msk.bf16.gmra.mrb[12].mxu1 %vm892_vm2, %v6310_v41 }
  0xba   : > { %1356 = vmatprep.mubr.bf16.mxu1 %v7046_v50 }
  0xbd   : > { %4542 = vmatmul.mubr.msk.bf16.gmra.mrb[44].mxu0 %vm892_vm2, %v6094_v42 }
  0xbe   : > { %2747 = vmatprep.mubr.bf16.mxu0 %v7046_v50 }
  0xc1   : > { %4423 = vmatmul.mubr.msk.bf16.gmra.mrb[16].mxu1 %vm892_vm2, %v6320_v9 }
  0xc2   : > { %1366 = vmatprep.mubr.bf16.mxu1 %v7046_v50 }
  0xc5   : > { %4543 = vmatmul.mubr.msk.bf16.gmra.mrb[48].mxu0 %vm892_vm2, %v6107_v0 }
  0xc6   : > { %2757 = vmatprep.mubr.bf16.mxu0 %v7046_v50 }
  0xc9   : > { %4424 = vmatmul.mubr.msk.bf16.gmra.mrb[20].mxu1 %vm892_vm2, %v6330_v51 }
  0xca   : > { %1376 = vmatprep.mubr.bf16.mxu1 %v7046_v50 }
  0xcd   : > { %4544 = vmatmul.mubr.msk.bf16.gmra.mrb[52].mxu0 %vm892_vm2, %v6123_v37 }
  0xce   : > { %2767 = vmatprep.mubr.bf16.mxu0 %v7046_v50 }
  0xd1   : > { %4425 = vmatmul.mubr.msk.bf16.gmra.mrb[24].mxu1 %vm892_vm2, %v6346_v52 }
  0xd2   : > { %1386 = vmatprep.mubr.bf16.mxu1 %v7046_v50 }
  0xd5   : > { %4545 = vmatmul.mubr.msk.bf16.gmra.mrb[56].mxu0 %vm892_vm2, %v6132_v53 }
  0xd6   : > { %2777 = vmatprep.mubr.bf16.mxu0 %v7046_v50 }
  0xd9   : > { %4426 = vmatmul.mubr.msk.bf16.gmra.mrb[28].mxu1 %vm892_vm2, %v6363_v13 }
  0xda   : > { %1396 = vmatprep.mubr.bf16.mxu1 %v7046_v50 }
  0xdd   : > { %4546 = vmatmul.mubr.msk.bf16.gmra.mrb[60].mxu0 %vm892_vm2, %v6372_v55 }
  0xde   : > { %2909 = vmatprep.mubr.bf16.mxu0 %v7046_v50 }
  0xe1   : > { %4427 = vmatmul.mubr.msk.bf16.gmra.mrb[32].mxu1 %vm892_vm2, %v6379_v30 }
  0xe2   : > { %1406 = vmatprep.mubr.bf16.mxu1 %v7046_v50 }
  0xe5   : > { %4551 = vmatmul.mubr.msk.bf16.vlgmr.msra.gmra.mrb[0].mxu0 %vm892_vm2, %v6300_v7 }
  0xe6   : > { %3182 = vmatpush1.bf16.msra.mxu0 %v3176_v12  ;;  %2919 = vmatprep.mubr.bf16.mxu0 %v7046_v50  ;;  %v7070_v12 = vld [vmem:[#allocation18_spill] sm:$0xff] }
  0xe7   : > { %4591 = vmatprep.subr.msk.bf16.mxu0 %vm941_vm0, %v3459_v45  ;;  %v7071_v45 = vld [vmem:[#allocation20_spill] sm:$0xff] }
  0xe9   : > { %4428 = vmatmul.mubr.msk.bf16.gmra.mrb[36].mxu1 %vm892_vm2, %v6140_v38 }
  0xea   : > { %1416 = vmatprep.mubr.bf16.mxu1 %v7046_v50 }
  0xed   : > { %4552 = vmatmul.mubr.msk.bf16.gmra.mrb[4].mxu0 %vm892_vm2, %v6310_v41 }
  0xee   : > { %2929 = vmatprep.mubr.bf16.mxu0 %v7046_v50 }
  0xf1   : > { %4429 = vmatmul.mubr.msk.bf16.gmra.mrb[40].mxu1 %vm892_vm2, %v6144_v25 }
  0xf2   : > { %1426 = vmatprep.mubr.bf16.mxu1 %v7046_v50 }
  0xf5   : > { %4553 = vmatmul.mubr.msk.bf16.gmra.mrb[8].mxu0 %vm892_vm2, %v6320_v9 }
  0xf6   : > { %2939 = vmatprep.mubr.bf16.mxu0 %v7046_v50 }
  0xf9   : > { %4430 = vmatmul.mubr.msk.bf16.gmra.mrb[44].mxu1 %vm892_vm2, %v6148_v29 }
  0xfa   : > { %1436 = vmatprep.mubr.bf16.mxu1 %v7046_v50 }
  0xfd   : > { %4554 = vmatmul.mubr.msk.bf16.gmra.mrb[12].mxu0 %vm892_vm2, %v6330_v51 }
  0xfe   : > { %2949 = vmatprep.mubr.bf16.mxu0 %v7046_v50 }
 0x101   : > { %4431 = vmatmul.mubr.msk.bf16.gmra.mrb[48].mxu1 %vm892_vm2, %v6175_v2 }
 0x102   : > { %1446 = vmatprep.mubr.bf16.mxu1 %v7046_v50 }
 0x105   : > { %4555 = vmatmul.mubr.msk.bf16.gmra.mrb[16].mxu0 %vm892_vm2, %v6346_v52 }
 0x106   : > { %2959 = vmatprep.mubr.bf16.mxu0 %v7046_v50 }
 0x109   : > { %4432 = vmatmul.mubr.msk.bf16.gmra.mrb[52].mxu1 %vm892_vm2, %v6206_v28 }
 0x10a   : > { %1456 = vmatprep.mubr.bf16.mxu1 %v7046_v50 }
 0x10d   : > { %4556 = vmatmul.mubr.msk.bf16.gmra.mrb[20].mxu0 %vm892_vm2, %v6363_v13 }
 0x10e   : > { %2969 = vmatprep.mubr.bf16.mxu0 %v7046_v50 }
 0x111   : > { %4433 = vmatmul.mubr.msk.bf16.gmra.mrb[56].mxu1 %vm892_vm2, %v6232_v49 }
 0x112   : > { %1466 = vmatprep.mubr.bf16.mxu1 %v7046_v50 }
 0x115   : > { %4557 = vmatmul.mubr.msk.bf16.gmra.mrb[24].mxu0 %vm892_vm2, %v6379_v30 }
 0x116   : > { %2979 = vmatprep.mubr.bf16.mxu0 %v7046_v50 }
 0x119   : > { %4434 = vmatmul.mubr.msk.bf16.gmra.mrb[60].mxu1 %vm892_vm2, %v6256_v1 }
 0x11a   : > { %1753 = vmatprep.mubr.bf16.mxu1 %v7046_v50 }
 0x11d   : > { %4558 = vmatmul.mubr.msk.bf16.gmra.mrb[28].mxu0 %vm892_vm2, %v6140_v38 }
 0x11e   : > { %2989 = vmatprep.mubr.bf16.mxu0 %v7046_v50 }
 0x121   : > { %4470 = vmatmul.mubr.msk.bf16.vlgmr.msra.gmra.mrb[0].mxu1 %vm892_vm2, %v4452_v47  ;;  %v2280_v47 = vshll.u32 %v6352_v19, 16 }
 0x122   : > { %2004 = vmatpush1.bf16.msra.mxu1 %v1998_v46  ;;  %1763 = vmatprep.mubr.bf16.mxu1 %v7046_v50  ;;  %v3138_v46 = vshll.u32 %v6503_v21, 16 }
 0x123   : > { %4806 = vmatprep.subr.msk.bf16.mxu1 %vm941_vm0, %v7062_v6  ;;  %v3144_v6 = vshll.u32 %v6506_v63, 16 }
 0x124   : > { %v3140_v19 = vrot.slane %v3138_v46, 5 }
 0x125   : > { %4559 = vmatmul.mubr.msk.bf16.gmra.mrb[32].mxu0 %vm892_vm2, %v6144_v25 }
 0x126   : > { %2999 = vmatprep.mubr.bf16.mxu0 %v7046_v50 }
 0x129   : > { %4471 = vmatmul.mubr.msk.bf16.gmra.mrb[4].mxu1 %vm892_vm2, %v5889_v31  ;;  %v6491_v31 = vcombine.low %v6350_v59, %v6340_v16 }
 0x12a   : > { %1773 = vmatprep.mubr.bf16.mxu1 %v7046_v50 }
 0x12d   : > { %4560 = vmatmul.mubr.msk.bf16.gmra.mrb[36].mxu0 %vm892_vm2, %v6148_v29 }
 0x12e   : > { %3009 = vmatprep.mubr.bf16.mxu0 %v7046_v50 }
 0x131   : > { %4472 = vmatmul.mubr.msk.bf16.gmra.mrb[8].mxu1 %vm892_vm2, %v7063_v33 }
 0x132   : > { %1783 = vmatprep.mubr.bf16.mxu1 %v7046_v50 }
 0x135   : > { %4561 = vmatmul.mubr.msk.bf16.gmra.mrb[40].mxu0 %vm892_vm2, %v6175_v2 }
 0x136   : > { %3019 = vmatprep.mubr.bf16.mxu0 %v7046_v50 }
 0x139   : > { %4473 = vmatmul.mubr.msk.bf16.gmra.mrb[12].mxu1 %vm892_vm2, %v5975_v62 }
 0x13a   : > { %1793 = vmatprep.mubr.bf16.mxu1 %v7046_v50 }
 0x13d   : > { %4562 = vmatmul.mubr.msk.bf16.gmra.mrb[44].mxu0 %vm892_vm2, %v6206_v28 }
 0x13e   : > { %3029 = vmatprep.mubr.bf16.mxu0 %v7046_v50 }
 0x141   : > { %4474 = vmatmul.mubr.msk.bf16.gmra.mrb[16].mxu1 %vm892_vm2, %v5983_v57 }
 0x142   : > { %1803 = vmatprep.mubr.bf16.mxu1 %v7046_v50 }
 0x145   : > { %4563 = vmatmul.mubr.msk.bf16.gmra.mrb[48].mxu0 %vm892_vm2, %v6232_v49 }
 0x146   : > { %3039 = vmatprep.mubr.bf16.mxu0 %v7046_v50 }
 0x149   : > { %4475 = vmatmul.mubr.msk.bf16.gmra.mrb[20].mxu1 %vm892_vm2, %v6177_v5 }
 0x14a   : > { %1813 = vmatprep.mubr.bf16.mxu1 %v7046_v50 }
 0x14d   : > { %4564 = vmatmul.mubr.msk.bf16.gmra.mrb[52].mxu0 %vm892_vm2, %v6256_v1 }
 0x14e   : > { %3049 = vmatprep.mubr.bf16.mxu0 %v7046_v50 }
 0x151   : > { %4476 = vmatmul.mubr.msk.bf16.gmra.mrb[24].mxu1 %vm892_vm2, %v6208_v23 }
 0x152   : > { %1823 = vmatprep.mubr.bf16.mxu1 %v7046_v50 }
 0x155   : > { %4565 = vmatmul.mubr.msk.bf16.gmra.mrb[56].mxu0 %vm892_vm2, %v6491_v31 }
 0x156   : > { %3059 = vmatprep.mubr.bf16.mxu0 %v7046_v50 }
 0x159   : > { %4477 = vmatmul.mubr.msk.bf16.gmra.mrb[28].mxu1 %vm892_vm2, %v6236_v40 }
 0x15a   : > { %1833 = vmatprep.mubr.bf16.mxu1 %v7046_v50 }
 0x15d   : > { %4566 = vmatmul.mubr.msk.bf16.gmra.mrb[60].mxu0 %vm892_vm2, %v4548_v34 }
 0x15e   : > { %3213 = vmatprep.mubr.bf16.mxu0 %v7046_v50 }
 0x161   : > { %4478 = vmatmul.mubr.msk.bf16.gmra.mrb[32].mxu1 %vm892_vm2, %v6260_v8 }
 0x162   : > { %1843 = vmatprep.mubr.bf16.mxu1 %v7046_v50 }
 0x165   : > { %4571 = vmatmul.mubr.msk.bf16.vlgmr.msra.gmra.mrb[0].mxu0 %vm892_vm2, %v7064_v18  ;;  %v2282_v18 = vrot.slane %v2280_v47, 5 }
 0x166   : > { %3470 = vmatpush1.bf16.msra.mxu0 %v3464_v43  ;;  %3223 = vmatprep.mubr.bf16.mxu0 %v7046_v50 }
 0x169   : > { %4479 = vmatmul.mubr.msk.bf16.gmra.mrb[36].mxu1 %vm892_vm2, %v6036_v24 }
 0x16a   : > { %1853 = vmatprep.mubr.bf16.mxu1 %v7046_v50 }
 0x16d   : > { %4572 = vmatmul.mubr.msk.bf16.gmra.mrb[4].mxu0 %vm892_vm2, %v7065_v58 }
 0x16e   : > { %3233 = vmatprep.mubr.bf16.mxu0 %v7046_v50 }
 0x171   : > { %4480 = vmatmul.mubr.msk.bf16.gmra.mrb[40].mxu1 %vm892_vm2, %v6045_v17 }
 0x172   : > { %1863 = vmatprep.mubr.bf16.mxu1 %v7046_v50 }
 0x175   : > { %4573 = vmatmul.mubr.msk.bf16.gmra.mrb[8].mxu0 %vm892_vm2, %v7066_v54  ;;  %v3146_v54 = vrot.slane %v3144_v6, 5 }
 0x176   : > { %3243 = vmatprep.mubr.bf16.mxu0 %v7046_v50 }
 0x179   : > { %4481 = vmatmul.mubr.msk.bf16.gmra.mrb[44].mxu1 %vm892_vm2, %v6074_v56 }
 0x17a   : > { %1873 = vmatprep.mubr.bf16.mxu1 %v7046_v50 }
 0x17d   : > { %4574 = vmatmul.mubr.msk.bf16.gmra.mrb[12].mxu0 %vm892_vm2, %v7067_v15 }
 0x17e   : > { %3253 = vmatprep.mubr.bf16.mxu0 %v7046_v50 }
 0x181   : > { %4482 = vmatmul.mubr.msk.bf16.gmra.mrb[48].mxu1 %vm892_vm2, %v6094_v42 }
 0x182   : > { %1883 = vmatprep.mubr.bf16.mxu1 %v7046_v50 }
 0x185   : > { %4575 = vmatmul.mubr.msk.bf16.gmra.mrb[16].mxu0 %vm892_vm2, %v7068_v36  ;;  %v6609_v36 = vld [vmem:[%s6497_s6 + $0x8] sm:$0x1] }
 0x186   : > { %3263 = vmatprep.mubr.bf16.mxu0 %v7046_v50 }
 0x189   : > { %4483 = vmatmul.mubr.msk.bf16.gmra.mrb[52].mxu1 %vm892_vm2, %v6107_v0 }
 0x18a   : > { %1893 = vmatprep.mubr.bf16.mxu1 %v7046_v50 }
 0x18d   : > { %4576 = vmatmul.mubr.msk.bf16.gmra.mrb[20].mxu0 %vm892_vm2, %v7069_v35 }
 0x18e   : > { %3273 = vmatprep.mubr.bf16.mxu0 %v7046_v50 }
 0x191   : > { %4484 = vmatmul.mubr.msk.bf16.gmra.mrb[56].mxu1 %vm892_vm2, %v6123_v37 }
 0x192   : > { %1903 = vmatprep.mubr.bf16.mxu1 %v7046_v50 }
 0x195   : > { %4577 = vmatmul.mubr.msk.bf16.gmra.mrb[24].mxu0 %vm892_vm2, %v7070_v12 }
 0x196   : > { %3283 = vmatprep.mubr.bf16.mxu0 %v7046_v50 }
 0x199   : > { %4485 = vmatmul.mubr.msk.bf16.gmra.mrb[60].mxu1 %vm892_vm2, %v6132_v53 }
 0x19a   : > { %2035 = vmatprep.mubr.bf16.mxu1 %v7046_v50 }
 0x19d   : > { %4578 = vmatmul.mubr.msk.bf16.gmra.mrb[28].mxu0 %vm892_vm2, %v7071_v45 }
 0x19e   : > { %3293 = vmatprep.mubr.bf16.mxu0 %v7046_v50 }
 0x1a1   : > { %4490 = vmatmul.mubr.msk.bf16.vlgmr.msra.gmra.mrb[0].mxu1 %vm892_vm2, %v6290_v3  ;;  %v2261_v3 = vshrl.u32 %v6350_v59, 16 }
 0x1a2   : > { %4807 = vmatpush1.bf16.msra.mxu1 %v7072_v14  ;;  %2045 = vmatprep.mubr.bf16.mxu1 %v7046_v50 }
 0x1a3   : > { %v2263_v48 = vrot.slane %v2261_v3, 4  ;;  %v3154_v3 = vshll.u32 %v6609_v36, 16 }
 0x1a5   : > { %4579 = vmatmul.mubr.msk.bf16.gmra.mrb[32].mxu0 %vm892_vm2, %v7073_v11 }
 0x1a6   : > { %3303 = vmatprep.mubr.bf16.mxu0 %v7046_v50 }
 0x1a9   : > { %4491 = vmatmul.mubr.msk.bf16.gmra.mrb[4].mxu1 %vm892_vm2, %v6300_v7  ;;  %v2264_v7 = vshll.u32 %v6350_v59, 16 }
 0x1aa   : > { %2055 = vmatprep.mubr.bf16.mxu1 %v7046_v50 }
 0x1ad   : > { %4580 = vmatmul.mubr.msk.bf16.gmra.mrb[36].mxu0 %vm892_vm2, %v5989_v10 }
 0x1ae   : > { %3313 = vmatprep.mubr.bf16.mxu0 %v7046_v50 }
 0x1b1   : > { %4492 = vmatmul.mubr.msk.bf16.gmra.mrb[8].mxu1 %vm892_vm2, %v6310_v41  ;;  %v2270_v41 = vshll.u32 %v6340_v16, 16  ;;  %v3135_v16 = vshrl.u32 %v6503_v21, 16 }
 0x1b2   : > { %2065 = vmatprep.mubr.bf16.mxu1 %v7046_v50 }
 0x1b3   : > { %v2272_v4 = vrot.slane %v2270_v41, 5  ;;  %v3137_v58 = vrot.slane %v3135_v16, 4 }
 0x1b5   : > { %4581 = vmatmul.mubr.msk.bf16.gmra.mrb[40].mxu0 %vm892_vm2, %v6156_v26  ;;  %v2277_v59 = vor.u32 %v2276_v44, %v2272_v4  ;;  %v3141_v12 = vor.u32 %v3140_v19, %v3137_v58  ;;  %v3728_v44 = vlaneseq }
 0x1b6   : > { %3323 = vmatprep.mubr.bf16.mxu0 %v7046_v50 }
 0x1b7   : > { %v2278_v43 = vrot.slane %v2277_v59, 4  ;;  %v3142_v41 = vrot.slane %v3141_v12, 4  ;;  %v3729_v16 = vshrl.u32 %v3728_v44, 7 }
 0x1b9   : > { %4493 = vmatmul.mubr.msk.bf16.gmra.mrb[12].mxu1 %vm892_vm2, %v6320_v9  ;;  %v2266_v9 = vrot.slane %v2264_v7, 5  ;;  %v3734_v46 = vsub.s32 1, %v3729_v16 }
 0x1ba   : > { %2075 = vmatprep.mubr.bf16.mxu1 %v7046_v50 }
 0x1bb   : > { %v2267_v32 = vor.u32 %v2266_v9, %v2263_v48  ;;  %v3156_v48 = vrot.slane %v3154_v3, 5  ;;  %v3147_v9 = vsel %vm5640_vm4, %v3142_v41, %v3146_v54 }
 0x1bd   : > { %4582 = vmatmul.mubr.msk.bf16.gmra.mrb[44].mxu0 %vm892_vm2, %v6194_v22  ;;  %v2268_v34 = vrot.slane %v2267_v32, 4 }
 0x1be   : > { %3333 = vmatprep.mubr.bf16.mxu0 %v7046_v50 }
 0x1bf   : > { %v2273_v35 = vsel %vm5640_vm4, %v2268_v34, %v2272_v4 }
 0x1c1   : > { %4494 = vmatmul.mubr.msk.bf16.gmra.mrb[16].mxu1 %vm892_vm2, %v6330_v51  ;;  %v3148_v51 = vshrl.u32 %v6506_v63, 16 }
 0x1c2   : > { %2085 = vmatprep.mubr.bf16.mxu1 %v7046_v50 }
 0x1c3   : > { %v3150_v15 = vrot.slane %v3148_v51, 4  ;;  %v3726_v51 = vld [vmem:[%s6995_s4] sm:$0x3] }
 0x1c4   : > { %v6783_v34 = vrot.slane %v3726_v51, %v3734_v46 }
 0x1c5   : > { %4583 = vmatmul.mubr.msk.bf16.gmra.mrb[48].mxu0 %vm892_vm2, %v6222_v20  ;;  %v3151_v14 = vor.u32 %v3150_v15, %v3146_v54 }
 0x1c6   : > { %3343 = vmatprep.mubr.bf16.mxu0 %v7046_v50 }
 0x1c7   : > { %v3152_v61 = vrot.slane %v3151_v14, 4 }
 0x1c9   : > { %4495 = vmatmul.mubr.msk.bf16.gmra.mrb[20].mxu1 %vm892_vm2, %v6346_v52  ;;  %v2283_v52 = vsel %vm5640_vm4, %v2278_v43, %v2282_v18  ;;  %v3157_v4 = vsel %vm5640_vm4, %v3152_v61, %v3156_v48 }
 0x1ca   : > { %2095 = vmatprep.mubr.bf16.mxu1 %v7046_v50  ;;  %v6621_v7 = vcombine.low %v2273_v35, %v2283_v52 }
 0x1cd   : > { %4584 = vmatmul.mubr.msk.bf16.gmra.mrb[52].mxu0 %vm892_vm2, %v6247_v27 }
 0x1ce   : > { %3353 = vmatprep.mubr.bf16.mxu0 %v7046_v50 }
 0x1d1   : > { %4496 = vmatmul.mubr.msk.bf16.gmra.mrb[24].mxu1 %vm892_vm2, %v6363_v13  ;;  %v4568_v13 = vcombine.low %v3147_v9, %v3157_v4 }
 0x1d2   : > { %2105 = vmatprep.mubr.bf16.mxu1 %v7046_v50 }
 0x1d5   : > { %4585 = vmatmul.mubr.msk.bf16.gmra.mrb[56].mxu0 %vm892_vm2, %v6621_v7 }
 0x1d6   : > { %3363 = vmatprep.mubr.bf16.mxu0 %v7046_v50 }
 0x1d9   : > { %4497 = vmatmul.mubr.msk.bf16.gmra.mrb[28].mxu1 %vm892_vm2, %v6379_v30 }
 0x1da   : > { %2115 = vmatprep.mubr.bf16.mxu1 %v7046_v50 }
 0x1dd   : > { %4586 = vmatmul.mubr.msk.bf16.gmra.mrb[60].mxu0 %vm892_vm2, %v4568_v13 }
 0x1de   : > { %3501 = vmatprep.mubr.bf16.mxu0 %v7046_v50 }
 0x1e1   : > { %4498 = vmatmul.mubr.msk.bf16.gmra.mrb[32].mxu1 %vm892_vm2, %v6140_v38 }
 0x1e2   : > { %2125 = vmatprep.mubr.bf16.mxu1 %v7046_v50 }
 0x1e5   : > { %4592 = vmatmul.mubr.msk.bf16.vlgmr.msra.gmra.mrb[0].mxu0 %vm892_vm2, %v7063_v33 }
 0x1e6   : > { %3511 = vmatprep.mubr.bf16.mxu0 %v7046_v50 }
 0x1e9   : > { %4499 = vmatmul.mubr.msk.bf16.gmra.mrb[36].mxu1 %vm892_vm2, %v6144_v25 }
 0x1ea   : > { %2135 = vmatprep.mubr.bf16.mxu1 %v7046_v50 }
 0x1ed   : > { %4593 = vmatmul.mubr.msk.bf16.gmra.mrb[4].mxu0 %vm892_vm2, %v5975_v62  ;;  %v3443_v62 = vrot.slane %v3441_v39, 4 }
 0x1ee   : > { %3521 = vmatprep.mubr.bf16.mxu0 %v7046_v50 }
 0x1f1   : > { %4500 = vmatmul.mubr.msk.bf16.gmra.mrb[40].mxu1 %vm892_vm2, %v6148_v29 }
 0x1f2   : > { %2145 = vmatprep.mubr.bf16.mxu1 %v7046_v50 }
 0x1f5   : > { %4594 = vmatmul.mubr.msk.bf16.gmra.mrb[8].mxu0 %vm892_vm2, %v5983_v57  ;;  %v3444_v57 = vrot.slane %v6609_v36, 5 }
 0x1f6   : > { %3531 = vmatprep.mubr.bf16.mxu0 %v7046_v50 }
 0x1f9   : > { %4501 = vmatmul.mubr.msk.bf16.gmra.mrb[44].mxu1 %vm892_vm2, %v6175_v2 }
 0x1fa   : > { %2155 = vmatprep.mubr.bf16.mxu1 %v7046_v50 }
 0x1fd   : > { %4595 = vmatmul.mubr.msk.bf16.gmra.mrb[12].mxu0 %vm892_vm2, %v6177_v5 }
 0x1fe   : > { %3541 = vmatprep.mubr.bf16.mxu0 %v7046_v50 }
 0x201   : > { %4502 = vmatmul.mubr.msk.bf16.gmra.mrb[48].mxu1 %vm892_vm2, %v6206_v28 }
 0x202   : > { %2165 = vmatprep.mubr.bf16.mxu1 %v7046_v50 }
 0x205   : > { %4596 = vmatmul.mubr.msk.bf16.gmra.mrb[16].mxu0 %vm892_vm2, %v6208_v23 }
 0x206   : > { %3551 = vmatprep.mubr.bf16.mxu0 %v7046_v50 }
 0x209   : > { %4503 = vmatmul.mubr.msk.bf16.gmra.mrb[52].mxu1 %vm892_vm2, %v6232_v49 }
 0x20a   : > { %2175 = vmatprep.mubr.bf16.mxu1 %v7046_v50 }
 0x20d   : > { %4597 = vmatmul.mubr.msk.bf16.gmra.mrb[20].mxu0 %vm892_vm2, %v6236_v40 }
 0x20e   : > { %3561 = vmatprep.mubr.bf16.mxu0 %v7046_v50 }
 0x211   : > { %4504 = vmatmul.mubr.msk.bf16.gmra.mrb[56].mxu1 %vm892_vm2, %v6256_v1 }
 0x212   : > { %2185 = vmatprep.mubr.bf16.mxu1 %v7046_v50 }
 0x215   : > { %4598 = vmatmul.mubr.msk.bf16.gmra.mrb[24].mxu0 %vm892_vm2, %v6260_v8 }
 0x216   : > { %3571 = vmatprep.mubr.bf16.mxu0 %v7046_v50 }
 0x219   : > { %4505 = vmatmul.mubr.msk.bf16.gmra.mrb[60].mxu1 %vm892_vm2, %v6491_v31 }
 0x21a   : > { %2419 = vmatprep.mubr.bf16.mxu1 %v7046_v50 }
 0x21d   : > { %4599 = vmatmul.mubr.msk.bf16.gmra.mrb[28].mxu0 %vm892_vm2, %v6036_v24  ;;  %v3445_v24 = vsel %vm5826_vm7, %v3443_v62, %v3444_v57 }
 0x21e   : > { %3581 = vmatprep.mubr.bf16.mxu0 %v7046_v50 }
 0x221   : > { %4518 = vmatmul.mubr.msk.bf16.vlgmr.msra.gmra.mrb[32].mxu1 %vm892_vm2, %v7071_v45 }
 0x222   : > { %2429 = vmatprep.mubr.bf16.mxu1 %v7046_v50 }
 0x225   : > { %4600 = vmatmul.mubr.msk.bf16.gmra.mrb[32].mxu0 %vm892_vm2, %v6045_v17 }
 0x226   : > { %3591 = vmatprep.mubr.bf16.mxu0 %v7046_v50 }
 0x229   : > { %4519 = vmatmul.mubr.msk.bf16.gmra.mrb[36].mxu1 %vm892_vm2, %v7073_v11 }
 0x22a   : > { %2439 = vmatprep.mubr.bf16.mxu1 %v7046_v50 }
 0x22d   : > { %4601 = vmatmul.mubr.msk.bf16.gmra.mrb[36].mxu0 %vm892_vm2, %v6074_v56 }
 0x22e   : > { %3601 = vmatprep.mubr.bf16.mxu0 %v7046_v50 }
 0x231   : > { %4520 = vmatmul.mubr.msk.bf16.gmra.mrb[40].mxu1 %vm892_vm2, %v5989_v10 }
 0x232   : > { %2449 = vmatprep.mubr.bf16.mxu1 %v7046_v50 }
 0x235   : > { %4602 = vmatmul.mubr.msk.bf16.gmra.mrb[40].mxu0 %vm892_vm2, %v6094_v42  ;;  %v4587_v42 = vrot.slane %v6503_v21, 9 }
 0x236   : > { %3611 = vmatprep.mubr.bf16.mxu0 %v7046_v50 }
 0x237   : > { %v3442_v10 = vsel %vm5826_vm7, %v4587_v42, %v3441_v39 }
 0x238   : > { %v4589_v17 = vcombine.low %v3442_v10, %v3445_v24 }
 0x239   : > { %4521 = vmatmul.mubr.msk.bf16.gmra.mrb[44].mxu1 %vm892_vm2, %v6156_v26 }
 0x23a   : > { %2459 = vmatprep.mubr.bf16.mxu1 %v7046_v50 }
 0x23d   : > { %4603 = vmatmul.mubr.msk.bf16.gmra.mrb[44].mxu0 %vm892_vm2, %v6107_v0 }
 0x23e   : > { %3621 = vmatprep.mubr.bf16.mxu0 %v7046_v50 }
 0x241   : > { %4522 = vmatmul.mubr.msk.bf16.gmra.mrb[48].mxu1 %vm892_vm2, %v6194_v22 }
 0x242   : > { %2469 = vmatprep.mubr.bf16.mxu1 %v7046_v50 }
 0x245   : > { %4604 = vmatmul.mubr.msk.bf16.gmra.mrb[48].mxu0 %vm892_vm2, %v6123_v37 }
 0x246   : > { %3631 = vmatprep.mubr.bf16.mxu0 %v7046_v50 }
 0x249   : > { %4523 = vmatmul.mubr.msk.bf16.gmra.mrb[52].mxu1 %vm892_vm2, %v6222_v20 }
 0x24a   : > { %2479 = vmatprep.mubr.bf16.mxu1 %v7046_v50 }
 0x24d   : > { %4605 = vmatmul.mubr.msk.bf16.gmra.mrb[52].mxu0 %vm892_vm2, %v6132_v53 }
 0x24e   : > { %3641 = vmatprep.mubr.bf16.mxu0 %v7046_v50 }
 0x251   : > { %4524 = vmatmul.mubr.msk.bf16.gmra.mrb[56].mxu1 %vm892_vm2, %v6247_v27 }
 0x252   : > { %2489 = vmatprep.mubr.bf16.mxu1 %v7046_v50 }
 0x255   : > { %4606 = vmatmul.mubr.msk.bf16.gmra.mrb[56].mxu0 %vm892_vm2, %v6372_v55 }
 0x256   : > { %3651 = vmatprep.mubr.bf16.mxu0 %v7046_v50 }
 0x259   : > { %4525 = vmatmul.mubr.msk.bf16.gmra.mrb[60].mxu1 %vm892_vm2, %v6621_v7 }
 0x25d   : > { %4607 = vmatmul.mubr.msk.bf16.gmra.mrb[60].mxu0 %vm892_vm2, %v4589_v17 }
 0x274   : > { %v2037_v56 = vpop.f32.mrb[0].mxu1 }
 0x275   : > { %v2039_v0 = vpop.f32.mrb[1].mxu1 }
 0x276   : > { %v2041_v37 = vpop.f32.mrb[2].mxu1 }
 0x277   : > { %v2043_v53 = vpop.f32.mrb[3].mxu1 }
 0x27c   : > { %v2047_v38 = vpop.f32.mrb[4].mxu1 }
 0x27d   : > { %v2049_v25 = vpop.f32.mrb[5].mxu1 }
 0x27e   : > { %v2051_v29 = vpop.f32.mrb[6].mxu1 }
 0x27f   : > { %v2053_v50 = vpop.f32.mrb[7].mxu1 }
 0x284   : > { %v2057_v26 = vpop.f32.mrb[8].mxu1 }
 0x285   : > { %v2059_v2 = vpop.f32.mrb[9].mxu1 }
 0x286   : > { %v6736_v5 = vpop.f32.mrb[10].mxu1 }
 0x287   : > { %v6738_v60 = vpop.f32.mrb[11].mxu1 }
 0x28c   : > { %v6740_v22 = vpop.f32.mrb[12].mxu1 }
 0x28d   : > { %v6742_v28 = vpop.f32.mrb[13].mxu1 }
 0x28e   : > { %v6744_v23 = vpop.f32.mrb[14].mxu1 }
 0x28f   : > { %v6746_v20 = vpop.f32.mrb[15].mxu1 }
 0x294   : > { %v6748_v49 = vpop.f32.mrb[16].mxu1 }
 0x295   : > { %v6750_v40 = vpop.f32.mrb[17].mxu1 }
 0x296   : > { %v6752_v27 = vpop.f32.mrb[18].mxu1 }
 0x297   : > { %v6754_v1 = vpop.f32.mrb[19].mxu1 }
 0x29c   : > { %v6756_v8 = vpop.f32.mrb[20].mxu1 }
 0x29d   : > { %v6758_v55 = vpop.f32.mrb[21].mxu1 }
 0x29e   : > { %v6760_v30 = vpop.f32.mrb[22].mxu1 }
 0x29f   : > { %v6762_v33 = vpop.f32.mrb[23].mxu1 }
 0x2a4   : > { %v6764_v31 = vpop.f32.mrb[24].mxu1 }
 0x2a5   : > { %v6766_v21 = vpop.f32.mrb[25].mxu1 }
 0x2a6   : > { %v6768_v63 = vpop.f32.mrb[26].mxu1 }
 0x2a7   : > { %v6770_v45 = vpop.f32.mrb[27].mxu1 }
 0x2ac   : > { %v6772_v11 = vpop.f32.mrb[28].mxu1 }
 0x2ad   : > { %v6774_v32 = vpop.f32.mrb[29].mxu1 }
 0x2ae   : > { %v6776_v59 = vpop.f32.mrb[30].mxu1 }
 0x2af   : > { %v6778_v47 = vpop.f32.mrb[31].mxu1 }
 0x2b8   : > { %v3503_v6 = vpop.f32.mrb[0].mxu0 }
 0x2b9   : > { %v4808_v43 = vadd.f32 %v3503_v6, %v2037_v56  ;;  %v3505_v18 = vpop.f32.mrb[1].mxu0 }
 0x2ba   : > { %v4809_v58 = vadd.f32 %v3505_v18, %v2039_v0  ;;  %v3507_v19 = vpop.f32.mrb[2].mxu0  ;;  %v3730_v0 = vsub.s32 0, %v3729_v16 }
 0x2bb   : > { %v4810_v54 = vadd.f32 %v3507_v19, %v2041_v37  ;;  %v3509_v15 = vpop.f32.mrb[3].mxu0 }
 0x2bc   : > { %v3739_v36 = vadd.f32 %v4809_v58, %v6783_v34  ;;  %v4811_v35 = vadd.f32 %v3509_v15, %v2043_v53 }
 0x2be   : > { %v4608_v52 = vmul.f32 -1.442695, %v3739_v36  ;;  %v3741_v12 = vadd.f32 %v4811_v35, %v6783_v34 }
 0x2c0   : > { %5366 = vpow2.f32 %v4608_v52  ;;  %v4609_v14 = vmul.f32 -1.442695, %v3741_v12  ;;  %v3513_v3 = vpop.f32.mrb[4].mxu0 }
 0x2c1   : > { %v6787_v7 = vadd.f32 %v3513_v3, %v2047_v38  ;;  %v3515_v41 = vpop.f32.mrb[5].mxu0 }
 0x2c2   : > { %5368 = vpow2.f32 %v4609_v14  ;;  %v4813_v61 = vadd.f32 %v3515_v41, %v2049_v25  ;;  %v3517_v48 = vpop.f32.mrb[6].mxu0 }
 0x2c3   : > { %v6789_v9 = vadd.f32 %v3517_v48, %v2051_v29  ;;  %v3519_v4 = vpop.f32.mrb[7].mxu0 }
 0x2c4   : > { %v3743_v13 = vadd.f32 %v4813_v61, %v6783_v34  ;;  %v4815_v39 = vadd.f32 %v3519_v4, %v2053_v50 }
 0x2c6   : > { %v4610_v42 = vmul.f32 -1.442695, %v3743_v13  ;;  %v3745_v62 = vadd.f32 %v4815_v39, %v6783_v34 }
 0x2c8   : > { %5370 = vpow2.f32 %v4610_v42  ;;  %v4611_v57 = vmul.f32 -1.442695, %v3745_v62  ;;  %v3523_v10 = vpop.f32.mrb[8].mxu0 }
 0x2c9   : > { %v6793_v24 = vadd.f32 %v3523_v10, %v2057_v26  ;;  %v3525_v17 = vpop.f32.mrb[9].mxu0  ;;  %v6800_v26 = vrot.slane %v3726_v51, %v3730_v0 }
 0x2ca   : > { %v5367_v56 = vpop.eup %5366  ;;  %5372 = vpow2.f32 %v4611_v57  ;;  %v4817_v37 = vadd.f32 %v3525_v17, %v2059_v2  ;;  %v3527_v53 = vpop.f32.mrb[10].mxu0 }
 0x2cb   : > { %v3930_v38 = vadd.f32 1.0, %v5367_v56  ;;  %v6796_v25 = vadd.f32 %v3527_v53, %v6736_v5  ;;  %v3529_v29 = vpop.f32.mrb[11].mxu0  ;;  %v3738_v36 = vadd.f32 %v4808_v43, %v6800_v26  ;;  %v3740_v3 = vadd.f32 %v4810_v54, %v6800_v26 }
 0x2cc   : > { %v5369_v50 = vpop.eup %5368  ;;  %v3747_v44 = vadd.f32 %v4817_v37, %v6783_v34  ;;  %v4819_v46 = vadd.f32 %v3529_v29, %v6738_v60  ;;  %v3742_v17 = vadd.f32 %v6787_v7, %v6800_v26  ;;  %v3744_v7 = vadd.f32 %v6789_v9, %v6800_v26 }
 0x2cd   : > { %5374 = vrcp.f32 %v3930_v38  ;;  %v3931_v6 = vadd.f32 1.0, %v5369_v50  ;;  %v3802_v43 = vmax.f32 %v3738_v36, 0.0  ;;  %v3803_v39 = vmax.f32 %v3740_v3, 0.0 }
 0x2ce   : > { %v4612_v18 = vmul.f32 -1.442695, %v3747_v44  ;;  %v3749_v16 = vadd.f32 %v4819_v46, %v6783_v34  ;;  %v3804_v46 = vmax.f32 %v3742_v17, 0.0 }
 0x2cf   : > { %5376 = vrcp.f32 %v3931_v6 }
 0x2d0   : > { %5378 = vpow2.f32 %v4612_v18  ;;  %v4613_v2 = vmul.f32 -1.442695, %v3749_v16  ;;  %v3533_v58 = vpop.f32.mrb[12].mxu0 }
 0x2d1   : > { %v6804_v5 = vadd.f32 %v3533_v58, %v6740_v22  ;;  %v3535_v19 = vpop.f32.mrb[13].mxu0 }
 0x2d2   : > { %v5371_v15 = vpop.eup %5370  ;;  %5380 = vpow2.f32 %v4613_v2  ;;  %v4821_v60 = vadd.f32 %v3535_v19, %v6742_v28  ;;  %v3537_v35 = vpop.f32.mrb[14].mxu0  ;;  %v3805_v2 = vmax.f32 %v3744_v7, 0.0 }
 0x2d3   : > { %v3932_v51 = vadd.f32 1.0, %v5371_v15  ;;  %v6809_v52 = vadd.f32 %v3537_v35, %v6744_v23  ;;  %v3539_v12 = vpop.f32.mrb[15].mxu0  ;;  %v3746_v35 = vadd.f32 %v6793_v24, %v6800_v26 }
 0x2d4   : > { %v5373_v14 = vpop.eup %5372  ;;  %v3751_v22 = vadd.f32 %v4821_v60, %v6783_v34  ;;  %v4823_v41 = vadd.f32 %v3539_v12, %v6746_v20 }
 0x2d5   : > { %5382 = vrcp.f32 %v3932_v51  ;;  %v3933_v61 = vadd.f32 1.0, %v5373_v14 }
 0x2d6   : > { %v4614_v48 = vmul.f32 -1.442695, %v3751_v22  ;;  %v3753_v28 = vadd.f32 %v4823_v41, %v6783_v34 }
 0x2d7   : > { %v5375_v4 = vpop.eup %5374  ;;  %5384 = vrcp.f32 %v3933_v61 }
 0x2d8   : > { %v4026_v13 = vmul.f32 %v5375_v4, %v3802_v43  ;;  %5386 = vpow2.f32 %v4614_v48  ;;  %v4615_v23 = vmul.f32 -1.442695, %v3753_v28  ;;  %v3543_v42 = vpop.f32.mrb[16].mxu0  ;;  %v3806_v28 = vmax.f32 %v3746_v35, 0.0 }
 0x2d9   : > { %v5377_v62 = vpop.eup %5376  ;;  %v6817_v54 = vadd.f32 %v3543_v42, %v6748_v49  ;;  %v3545_v57 = vpop.f32.mrb[17].mxu0 }
 0x2da   : > { %v5379_v20 = vpop.eup %5378  ;;  %v4027_v10 = vmul.f32 %v5377_v62, %v3803_v39  ;;  %5388 = vpow2.f32 %v4615_v23  ;;  %v4825_v56 = vadd.f32 %v3545_v57, %v6750_v40  ;;  %v3547_v0 = vpop.f32.mrb[18].mxu0 }
 0x2db   : > { %v3934_v37 = vadd.f32 1.0, %v5379_v20  ;;  %v6828_v49 = vadd.f32 %v3547_v0, %v6752_v27  ;;  %v3549_v53 = vpop.f32.mrb[19].mxu0 }
 0x2dc   : > { %v5381_v38 = vpop.eup %5380  ;;  %v4714_v29 = vpack.c.bf16 %v4027_v10, %v4026_v13  ;;  %v3755_v50 = vadd.f32 %v4825_v56, %v6783_v34  ;;  %v4827_v40 = vadd.f32 %v3549_v53, %v6754_v1  ;;  %v3750_v10 = vadd.f32 %v6804_v5, %v6800_v26 }
 0x2dd   : > { %5390 = vrcp.f32 %v3934_v37  ;;  %v3935_v44 = vadd.f32 1.0, %v5381_v38 }
 0x2de   : > { %4715 = vst [vmem:[%s6825_s18] sm:$0xff] %v4714_v29   ;;  %v4616_v6 = vmul.f32 -1.442695, %v3755_v50  ;;  %v3757_v18 = vadd.f32 %v4827_v40, %v6783_v34  ;;  %v3808_v40 = vmax.f32 %v3750_v10, 0.0 }
 0x2df   : > { %v5383_v16 = vpop.eup %5382  ;;  %5392 = vrcp.f32 %v3935_v44 }
 0x2e0   : > { %v4028_v27 = vmul.f32 %v5383_v16, %v3804_v46  ;;  %5394 = vpow2.f32 %v4616_v6  ;;  %v4617_v58 = vmul.f32 -1.442695, %v3757_v18  ;;  %v3553_v19 = vpop.f32.mrb[20].mxu0 }
 0x2e1   : > { %v5385_v15 = vpop.eup %5384  ;;  %v6837_v9 = vadd.f32 %v3553_v19, %v6756_v8  ;;  %v3555_v36 = vpop.f32.mrb[21].mxu0  ;;  %v3748_v8 = vadd.f32 %v6796_v25, %v6800_v26  ;;  %v3754_v19 = vadd.f32 %v6817_v54, %v6800_v26 }
 0x2e2   : > { %v5387_v1 = vpop.eup %5386  ;;  %v4029_v60 = vmul.f32 %v5385_v15, %v3805_v2  ;;  %5396 = vpow2.f32 %v4617_v58  ;;  %v4829_v51 = vadd.f32 %v3555_v36, %v6758_v55  ;;  %v3557_v12 = vpop.f32.mrb[22].mxu0 }
 0x2e3   : > { %v3936_v14 = vadd.f32 1.0, %v5387_v1  ;;  %v6843_v3 = vadd.f32 %v3557_v12, %v6760_v30  ;;  %v3559_v22 = vpop.f32.mrb[23].mxu0  ;;  %v3807_v39 = vmax.f32 %v3748_v8, 0.0 }
 0x2e4   : > { %v5389_v41 = vpop.eup %5388  ;;  %v4719_v61 = vpack.c.bf16 %v4029_v60, %v4028_v27  ;;  %v3759_v43 = vadd.f32 %v4829_v51, %v6783_v34  ;;  %v4831_v48 = vadd.f32 %v3559_v22, %v6762_v33 }
 0x2e5   : > { %5398 = vrcp.f32 %v3936_v14  ;;  %v3937_v24 = vadd.f32 1.0, %v5389_v41 }
 0x2e6   : > { %4791 = vst [vmem:[%s6825_s18 + $0x8] sm:$0xff] %v4719_v61   ;;  %v4618_v55 = vmul.f32 -1.442695, %v3759_v43  ;;  %v3761_v4 = vadd.f32 %v4831_v48, %v6783_v34 }
 0x2e7   : > { %v5391_v13 = vpop.eup %5390  ;;  %5400 = vrcp.f32 %v3937_v24 }
 0x2e8   : > { %v4030_v30 = vmul.f32 %v5391_v13, %v3806_v28  ;;  %5402 = vpow2.f32 %v4618_v55  ;;  %v4619_v23 = vmul.f32 -1.442695, %v3761_v4  ;;  %v3563_v42 = vpop.f32.mrb[24].mxu0 }
 0x2e9   : > { %v5393_v62 = vpop.eup %5392  ;;  %v6852_v25 = vadd.f32 %v3563_v42, %v6764_v31  ;;  %v3565_v57 = vpop.f32.mrb[25].mxu0  ;;  %v3752_v31 = vadd.f32 %v6809_v52, %v6800_v26  ;;  %v3758_v42 = vadd.f32 %v6837_v9, %v6800_v26 }
 0x2ea   : > { %v5395_v33 = vpop.eup %5394  ;;  %v4031_v20 = vmul.f32 %v5393_v62, %v3807_v39  ;;  %5404 = vpow2.f32 %v4619_v23  ;;  %v4833_v17 = vadd.f32 %v3565_v57, %v6766_v21  ;;  %v3567_v56 = vpop.f32.mrb[26].mxu0 }
 0x2eb   : > { %v3938_v0 = vadd.f32 1.0, %v5395_v33  ;;  %v6858_v37 = vadd.f32 %v3567_v56, %v6768_v63  ;;  %v3569_v53 = vpop.f32.mrb[27].mxu0  ;;  %v3809_v6 = vmax.f32 %v3752_v31, 0.0 }
 0x2ec   : > { %v5397_v38 = vpop.eup %5396  ;;  %v4724_v29 = vpack.c.bf16 %v4031_v20, %v4030_v30  ;;  %v3763_v7 = vadd.f32 %v4833_v17, %v6783_v34  ;;  %v4835_v50 = vadd.f32 %v3569_v53, %v6770_v45 }
 0x2ed   : > { %5406 = vrcp.f32 %v3938_v0  ;;  %v3939_v5 = vadd.f32 1.0, %v5397_v38  ;;  %v3760_v0 = vadd.f32 %v6843_v3, %v6800_v26 }
 0x2ee   : > { %4792 = vst [vmem:[%s6825_s18 + $0x10] sm:$0xff] %v4724_v29   ;;  %v4620_v21 = vmul.f32 -1.442695, %v3763_v7  ;;  %v3765_v44 = vadd.f32 %v4835_v50, %v6783_v34  ;;  %v3812_v7 = vmax.f32 %v3758_v42, 0.0 }
 0x2ef   : > { %v5399_v46 = vpop.eup %5398  ;;  %5408 = vrcp.f32 %v3939_v5 }
 0x2f0   : > { %v4032_v63 = vmul.f32 %v5399_v46, %v3808_v40  ;;  %5410 = vpow2.f32 %v4620_v21  ;;  %v4621_v18 = vmul.f32 -1.442695, %v3765_v44  ;;  %v3573_v16 = vpop.f32.mrb[28].mxu0 }
 0x2f1   : > { %v5401_v27 = vpop.eup %5400  ;;  %v6867_v52 = vadd.f32 %v3573_v16, %v6772_v11  ;;  %v3575_v2 = vpop.f32.mrb[29].mxu0  ;;  %v3756_v11 = vadd.f32 %v6828_v49, %v6800_v26 }
 0x2f2   : > { %v5403_v45 = vpop.eup %5402  ;;  %v4033_v58 = vmul.f32 %v5401_v27, %v3809_v6  ;;  %5412 = vpow2.f32 %v4621_v18  ;;  %v4837_v15 = vadd.f32 %v3575_v2, %v6774_v32  ;;  %v3577_v36 = vpop.f32.mrb[30].mxu0  ;;  %v3810_v32 = vmax.f32 %v3754_v19, 0.0 }
 0x2f3   : > { %v3940_v1 = vadd.f32 1.0, %v5403_v45  ;;  %v6873_v60 = vadd.f32 %v3577_v36, %v6776_v59  ;;  %v3579_v35 = vpop.f32.mrb[31].mxu0  ;;  %v3811_v55 = vmax.f32 %v3756_v11, 0.0  ;;  %v3764_v11 = vadd.f32 %v6858_v37, %v6800_v26 }
 0x2f4   : > { %v5405_v51 = vpop.eup %5404  ;;  %v4729_v12 = vpack.c.bf16 %v4033_v58, %v4032_v63  ;;  %v3767_v14 = vadd.f32 %v4837_v15, %v6783_v34  ;;  %v4839_v22 = vadd.f32 %v3579_v35, %v6778_v47  ;;  %v2421_v54 = vpop.f32.mrb[32].mxu1  ;;  %v3813_v63 = vmax.f32 %v3760_v0, 0.0 }
 0x2f5   : > { %5414 = vrcp.f32 %v3940_v1  ;;  %v3941_v41 = vadd.f32 1.0, %v5405_v51  ;;  %v2423_v61 = vpop.f32.mrb[33].mxu1  ;;  %v3762_v58 = vadd.f32 %v6852_v25, %v6800_v26  ;;  %v3768_v0 = vadd.f32 %v6873_v60, %v6800_v26 }
 0x2f6   : > { %4793 = vst [vmem:[%s6825_s18 + $0x18] sm:$0xff] %v4729_v12   ;;  %v4622_v8 = vmul.f32 -1.442695, %v3767_v14  ;;  %v3769_v59 = vadd.f32 %v4839_v22, %v6783_v34  ;;  %v2425_v43 = vpop.f32.mrb[34].mxu1 }
 0x2f7   : > { %v5407_v48 = vpop.eup %5406  ;;  %5416 = vrcp.f32 %v3941_v41  ;;  %v2427_v24 = vpop.f32.mrb[35].mxu1 }
 0x2f8   : > { %v4034_v28 = vmul.f32 %v5407_v48, %v3810_v32  ;;  %5418 = vpow2.f32 %v4622_v8  ;;  %v4623_v49 = vmul.f32 -1.442695, %v3769_v59  ;;  %v3583_v4 = vpop.f32.mrb[32].mxu0 }
 0x2f9   : > { %v5409_v13 = vpop.eup %5408  ;;  %v6881_v47 = vadd.f32 %v3583_v4, %v2421_v54  ;;  %v3585_v30 = vpop.f32.mrb[33].mxu0 }
 0x2fa   : > { %v5411_v39 = vpop.eup %5410  ;;  %v4035_v23 = vmul.f32 %v5409_v13, %v3811_v55  ;;  %5420 = vpow2.f32 %v4623_v49  ;;  %v4841_v62 = vadd.f32 %v3585_v30, %v2423_v61  ;;  %v3587_v57 = vpop.f32.mrb[34].mxu0  ;;  %v3814_v61 = vmax.f32 %v3762_v58, 0.0 }
 0x2fb   : > { %v3942_v33 = vadd.f32 1.0, %v5411_v39  ;;  %v6885_v20 = vadd.f32 %v3587_v57, %v2425_v43  ;;  %v3589_v10 = vpop.f32.mrb[35].mxu0 }
 0x2fc   : > { %v5413_v17 = vpop.eup %5412  ;;  %v4734_v56 = vpack.c.bf16 %v4035_v23, %v4034_v28  ;;  %v3771_v53 = vadd.f32 %v4841_v62, %v6783_v34  ;;  %v4843_v38 = vadd.f32 %v3589_v10, %v2427_v24  ;;  %v2431_v29 = vpop.f32.mrb[36].mxu1  ;;  %v3815_v28 = vmax.f32 %v3764_v11, 0.0 }
 0x2fd   : > { %5422 = vrcp.f32 %v3942_v33  ;;  %v3943_v31 = vadd.f32 1.0, %v5413_v17  ;;  %v2433_v9 = vpop.f32.mrb[37].mxu1  ;;  %v3766_v23 = vadd.f32 %v6867_v52, %v6800_v26  ;;  %v3772_v11 = vadd.f32 %v6885_v20, %v6800_v26 }
 0x2fe   : > { %4794 = vst [vmem:[%s6825_s18 + $0x20] sm:$0xff] %v4734_v56   ;;  %v4624_v50 = vmul.f32 -1.442695, %v3771_v53  ;;  %v3773_v5 = vadd.f32 %v4843_v38, %v6783_v34  ;;  %v2435_v40 = vpop.f32.mrb[38].mxu1 }
 0x2ff   : > { %v5415_v21 = vpop.eup %5414  ;;  %5424 = vrcp.f32 %v3943_v31  ;;  %v2437_v44 = vpop.f32.mrb[39].mxu1 }
 0x300   : > { %v4036_v46 = vmul.f32 %v5415_v21, %v3812_v7  ;;  %5426 = vpow2.f32 %v4624_v50  ;;  %v4625_v3 = vmul.f32 -1.442695, %v3773_v5  ;;  %v3593_v6 = vpop.f32.mrb[36].mxu0 }
 0x301   : > { %v5417_v18 = vpop.eup %5416  ;;  %v6892_v16 = vadd.f32 %v3593_v6, %v2431_v29  ;;  %v3595_v27 = vpop.f32.mrb[37].mxu0 }
 0x302   : > { %v5419_v2 = vpop.eup %5418  ;;  %v4037_v45 = vmul.f32 %v5417_v18, %v3813_v63  ;;  %5428 = vpow2.f32 %v4625_v3  ;;  %v4845_v19 = vadd.f32 %v3595_v27, %v2433_v9  ;;  %v3597_v15 = vpop.f32.mrb[38].mxu0  ;;  %v3816_v9 = vmax.f32 %v3766_v23, 0.0 }
 0x303   : > { %v3944_v36 = vadd.f32 1.0, %v5419_v2  ;;  %v6896_v1 = vadd.f32 %v3597_v15, %v2435_v40  ;;  %v3599_v35 = vpop.f32.mrb[39].mxu0 }
 0x304   : > { %v5421_v51 = vpop.eup %5420  ;;  %v4739_v12 = vpack.c.bf16 %v4037_v45, %v4036_v46  ;;  %v3775_v14 = vadd.f32 %v4845_v19, %v6783_v34  ;;  %v4847_v22 = vadd.f32 %v3599_v35, %v2437_v44  ;;  %v2441_v54 = vpop.f32.mrb[40].mxu1  ;;  %v3817_v46 = vmax.f32 %v3768_v0, 0.0 }
 0x305   : > { %5430 = vrcp.f32 %v3944_v36  ;;  %v3945_v41 = vadd.f32 1.0, %v5421_v51  ;;  %v2443_v25 = vpop.f32.mrb[41].mxu1  ;;  %v3770_v45 = vadd.f32 %v6881_v47, %v6800_v26  ;;  %v3776_v0 = vadd.f32 %v6896_v1, %v6800_v26 }
 0x306   : > { %4795 = vst [vmem:[%s6825_s18 + $0x28] sm:$0xff] %v4739_v12   ;;  %v4626_v32 = vmul.f32 -1.442695, %v3775_v14  ;;  %v3777_v8 = vadd.f32 %v4847_v22, %v6783_v34  ;;  %v2445_v59 = vpop.f32.mrb[42].mxu1 }
 0x307   : > { %v5423_v43 = vpop.eup %5422  ;;  %5432 = vrcp.f32 %v3945_v41  ;;  %v2447_v48 = vpop.f32.mrb[43].mxu1 }
 0x308   : > { %v4038_v24 = vmul.f32 %v5423_v43, %v3814_v61  ;;  %5434 = vpow2.f32 %v4626_v32  ;;  %v4627_v37 = vmul.f32 -1.442695, %v3777_v8  ;;  %v3603_v55 = vpop.f32.mrb[40].mxu0 }
 0x309   : > { %v5425_v49 = vpop.eup %5424  ;;  %v6903_v4 = vadd.f32 %v3603_v55, %v2441_v54  ;;  %v3605_v13 = vpop.f32.mrb[41].mxu0 }
 0x30a   : > { %v5427_v30 = vpop.eup %5426  ;;  %v4039_v39 = vmul.f32 %v5425_v49, %v3815_v28  ;;  %5436 = vpow2.f32 %v4627_v37  ;;  %v4849_v42 = vadd.f32 %v3605_v13, %v2443_v25  ;;  %v3607_v62 = vpop.f32.mrb[42].mxu0  ;;  %v3818_v25 = vmax.f32 %v3770_v45, 0.0 }
 0x30b   : > { %v3946_v57 = vadd.f32 1.0, %v5427_v30  ;;  %v6907_v33 = vadd.f32 %v3607_v62, %v2445_v59  ;;  %v3609_v10 = vpop.f32.mrb[43].mxu0 }
 0x30c   : > { %v5429_v17 = vpop.eup %5428  ;;  %v4744_v56 = vpack.c.bf16 %v4039_v39, %v4038_v24  ;;  %v3779_v53 = vadd.f32 %v4849_v42, %v6783_v34  ;;  %v4851_v38 = vadd.f32 %v3609_v10, %v2447_v48  ;;  %v2451_v29 = vpop.f32.mrb[44].mxu1  ;;  %v3819_v24 = vmax.f32 %v3772_v11, 0.0 }
 0x30d   : > { %5438 = vrcp.f32 %v3946_v57  ;;  %v3947_v31 = vadd.f32 1.0, %v5429_v17  ;;  %v2453_v52 = vpop.f32.mrb[45].mxu1  ;;  %v3774_v39 = vadd.f32 %v6892_v16, %v6800_v26  ;;  %v3780_v11 = vadd.f32 %v6907_v33, %v6800_v26 }
 0x30e   : > { %4796 = vst [vmem:[%s6825_s18 + $0x30] sm:$0xff] %v4744_v56   ;;  %v4628_v7 = vmul.f32 -1.442695, %v3779_v53  ;;  %v3781_v50 = vadd.f32 %v4851_v38, %v6783_v34  ;;  %v2455_v5 = vpop.f32.mrb[46].mxu1 }
 0x30f   : > { %v5431_v40 = vpop.eup %5430  ;;  %5440 = vrcp.f32 %v3947_v31  ;;  %v2457_v21 = vpop.f32.mrb[47].mxu1 }
 0x310   : > { %v4040_v44 = vmul.f32 %v5431_v40, %v3816_v9  ;;  %5442 = vpow2.f32 %v4628_v7  ;;  %v4629_v60 = vmul.f32 -1.442695, %v3781_v50  ;;  %v3613_v63 = vpop.f32.mrb[44].mxu0 }
 0x311   : > { %v5433_v3 = vpop.eup %5432  ;;  %v6914_v6 = vadd.f32 %v3613_v63, %v2451_v29  ;;  %v3615_v18 = vpop.f32.mrb[45].mxu0 }
 0x312   : > { %v5435_v27 = vpop.eup %5434  ;;  %v4041_v2 = vmul.f32 %v5433_v3, %v3817_v46  ;;  %5444 = vpow2.f32 %v4629_v60  ;;  %v4853_v58 = vadd.f32 %v3615_v18, %v2453_v52  ;;  %v3617_v19 = vpop.f32.mrb[46].mxu0  ;;  %v3820_v52 = vmax.f32 %v3774_v39, 0.0 }
 0x313   : > { %v3948_v15 = vadd.f32 1.0, %v5435_v27  ;;  %v6918_v36 = vadd.f32 %v3617_v19, %v2455_v5  ;;  %v3619_v35 = vpop.f32.mrb[47].mxu0 }
 0x314   : > { %v5437_v51 = vpop.eup %5436  ;;  %v4749_v12 = vpack.c.bf16 %v4041_v2, %v4040_v44  ;;  %v3783_v14 = vadd.f32 %v4853_v58, %v6783_v34  ;;  %v4855_v22 = vadd.f32 %v3619_v35, %v2457_v21  ;;  %v2461_v54 = vpop.f32.mrb[48].mxu1  ;;  %v3821_v44 = vmax.f32 %v3776_v0, 0.0 }
 0x315   : > { %5446 = vrcp.f32 %v3948_v15  ;;  %v3949_v41 = vadd.f32 1.0, %v5437_v51  ;;  %v2463_v47 = vpop.f32.mrb[49].mxu1  ;;  %v3778_v2 = vadd.f32 %v6903_v4, %v6800_v26  ;;  %v3784_v0 = vadd.f32 %v6918_v36, %v6800_v26 }
 0x316   : > { %4797 = vst [vmem:[%s6825_s18 + $0x38] sm:$0xff] %v4749_v12   ;;  %v4630_v61 = vmul.f32 -1.442695, %v3783_v14  ;;  %v3785_v32 = vadd.f32 %v4855_v22, %v6783_v34  ;;  %v2465_v8 = vpop.f32.mrb[50].mxu1 }
 0x317   : > { %v5439_v59 = vpop.eup %5438  ;;  %5448 = vrcp.f32 %v3949_v41  ;;  %v2467_v43 = vpop.f32.mrb[51].mxu1 }
 0x318   : > { %v4042_v48 = vmul.f32 %v5439_v59, %v3818_v25  ;;  %5450 = vpow2.f32 %v4630_v61  ;;  %v4631_v20 = vmul.f32 -1.442695, %v3785_v32  ;;  %v3623_v28 = vpop.f32.mrb[48].mxu0 }
 0x319   : > { %v5441_v37 = vpop.eup %5440  ;;  %v6925_v55 = vadd.f32 %v3623_v28, %v2461_v54  ;;  %v3625_v49 = vpop.f32.mrb[49].mxu0 }
 0x31a   : > { %v5443_v13 = vpop.eup %5442  ;;  %v4043_v30 = vmul.f32 %v5441_v37, %v3819_v24  ;;  %5452 = vpow2.f32 %v4631_v20  ;;  %v4857_v23 = vadd.f32 %v3625_v49, %v2463_v47  ;;  %v3627_v42 = vpop.f32.mrb[50].mxu0  ;;  %v3822_v47 = vmax.f32 %v3778_v2, 0.0 }
 0x31b   : > { %v3950_v62 = vadd.f32 1.0, %v5443_v13  ;;  %v6929_v57 = vadd.f32 %v3627_v42, %v2465_v8  ;;  %v3629_v10 = vpop.f32.mrb[51].mxu0 }
 0x31c   : > { %v5445_v17 = vpop.eup %5444  ;;  %v4754_v56 = vpack.c.bf16 %v4043_v30, %v4042_v48  ;;  %v3787_v53 = vadd.f32 %v4857_v23, %v6783_v34  ;;  %v4859_v38 = vadd.f32 %v3629_v10, %v2467_v43  ;;  %v2471_v29 = vpop.f32.mrb[52].mxu1  ;;  %v3823_v48 = vmax.f32 %v3780_v11, 0.0 }
 0x31d   : > { %5454 = vrcp.f32 %v3950_v62  ;;  %v3951_v31 = vadd.f32 1.0, %v5445_v17  ;;  %v2473_v16 = vpop.f32.mrb[53].mxu1  ;;  %v3782_v30 = vadd.f32 %v6914_v6, %v6800_v26  ;;  %v3788_v11 = vadd.f32 %v6929_v57, %v6800_v26 }
 0x31e   : > { %4798 = vst [vmem:[%s6825_s18 + $0x40] sm:$0xff] %v4754_v56   ;;  %v4632_v9 = vmul.f32 -1.442695, %v3787_v53  ;;  %v3789_v7 = vadd.f32 %v4859_v38, %v6783_v34  ;;  %v2475_v50 = vpop.f32.mrb[54].mxu1 }
 0x31f   : > { %v5447_v5 = vpop.eup %5446  ;;  %5456 = vrcp.f32 %v3951_v31  ;;  %v2477_v40 = vpop.f32.mrb[55].mxu1 }
 0x320   : > { %v4044_v21 = vmul.f32 %v5447_v5, %v3820_v52  ;;  %5458 = vpow2.f32 %v4632_v9  ;;  %v4633_v1 = vmul.f32 -1.442695, %v3789_v7  ;;  %v3633_v46 = vpop.f32.mrb[52].mxu0 }
 0x321   : > { %v5449_v60 = vpop.eup %5448  ;;  %v6936_v63 = vadd.f32 %v3633_v46, %v2471_v29  ;;  %v3635_v3 = vpop.f32.mrb[53].mxu0 }
 0x322   : > { %v5451_v18 = vpop.eup %5450  ;;  %v4045_v27 = vmul.f32 %v5449_v60, %v3821_v44  ;;  %5460 = vpow2.f32 %v4633_v1  ;;  %v4861_v45 = vadd.f32 %v3635_v3, %v2473_v16  ;;  %v3637_v58 = vpop.f32.mrb[54].mxu0  ;;  %v3824_v16 = vmax.f32 %v3782_v30, 0.0 }
 0x323   : > { %v3952_v19 = vadd.f32 1.0, %v5451_v18  ;;  %v6940_v15 = vadd.f32 %v3637_v58, %v2475_v50  ;;  %v3639_v35 = vpop.f32.mrb[55].mxu0 }
 0x324   : > { %v5453_v51 = vpop.eup %5452  ;;  %v4759_v12 = vpack.c.bf16 %v4045_v27, %v4044_v21  ;;  %v3791_v14 = vadd.f32 %v4861_v45, %v6783_v34  ;;  %v4863_v22 = vadd.f32 %v3639_v35, %v2477_v40  ;;  %v2481_v54 = vpop.f32.mrb[56].mxu1  ;;  %v3825_v21 = vmax.f32 %v3784_v0, 0.0 }
 0x325   : > { %5462 = vrcp.f32 %v3952_v19  ;;  %v3953_v41 = vadd.f32 1.0, %v5453_v51  ;;  %v2483_v4 = vpop.f32.mrb[57].mxu1  ;;  %v3786_v27 = vadd.f32 %v6925_v55, %v6800_v26 }
 0x326   : > { %4799 = vst [vmem:[%s6825_s18 + $0x48] sm:$0xff] %v4759_v12   ;;  %v4634_v25 = vmul.f32 -1.442695, %v3791_v14  ;;  %v3793_v61 = vadd.f32 %v4863_v22, %v6783_v34  ;;  %v2485_v32 = vpop.f32.mrb[58].mxu1 }
 0x327   : > { %v5455_v8 = vpop.eup %5454  ;;  %5464 = vrcp.f32 %v3953_v41  ;;  %v2487_v59 = vpop.f32.mrb[59].mxu1  ;;  %v3826_v41 = vmax.f32 %v3786_v27, 0.0 }
 0x328   : > { %v4046_v43 = vmul.f32 %v5455_v8, %v3822_v47  ;;  %5466 = vpow2.f32 %v4634_v25  ;;  %v4635_v33 = vmul.f32 -1.442695, %v3793_v61  ;;  %v3643_v24 = vpop.f32.mrb[56].mxu0  ;;  %v3827_v61 = vmax.f32 %v3788_v11, 0.0 }
 0x329   : > { %v5457_v20 = vpop.eup %5456  ;;  %v6947_v28 = vadd.f32 %v3643_v24, %v2481_v54  ;;  %v3645_v37 = vpop.f32.mrb[57].mxu0 }
 0x32a   : > { %v5459_v49 = vpop.eup %5458  ;;  %v4047_v13 = vmul.f32 %v5457_v20, %v3823_v48  ;;  %5468 = vpow2.f32 %v4635_v33  ;;  %v4865_v39 = vadd.f32 %v3645_v37, %v2483_v4  ;;  %v3647_v23 = vpop.f32.mrb[58].mxu0 }
 0x32b   : > { %v3954_v42 = vadd.f32 1.0, %v5459_v49  ;;  %v6951_v62 = vadd.f32 %v3647_v23, %v2485_v32  ;;  %v3649_v10 = vpop.f32.mrb[59].mxu0 }
 0x32c   : > { %v5461_v17 = vpop.eup %5460  ;;  %v4764_v56 = vpack.c.bf16 %v4047_v13, %v4046_v43  ;;  %v3795_v53 = vadd.f32 %v4865_v39, %v6783_v34  ;;  %v4867_v38 = vadd.f32 %v3649_v10, %v2487_v59  ;;  %v2491_v29 = vpop.f32.mrb[60].mxu1  ;;  %v3790_v43 = vadd.f32 %v6936_v63, %v6800_v26 }
 0x32d   : > { %5470 = vrcp.f32 %v3954_v42  ;;  %v3955_v31 = vadd.f32 1.0, %v5461_v17  ;;  %v2493_v6 = vpop.f32.mrb[61].mxu1  ;;  %v3794_v63 = vadd.f32 %v6947_v28, %v6800_v26 }
 0x32e   : > { %4800 = vst [vmem:[%s6825_s18 + $0x50] sm:$0xff] %v4764_v56   ;;  %v4636_v52 = vmul.f32 -1.442695, %v3795_v53  ;;  %v3797_v9 = vadd.f32 %v4867_v38, %v6783_v34  ;;  %v2495_v7 = vpop.f32.mrb[62].mxu1  ;;  %v3828_v37 = vmax.f32 %v3790_v43, 0.0 }
 0x32f   : > { %v5463_v50 = vpop.eup %5462  ;;  %5472 = vrcp.f32 %v3955_v31  ;;  %v2497_v5 = vpop.f32.mrb[63].mxu1  ;;  %v3830_v53 = vmax.f32 %v3794_v63, 0.0 }
 0x330   : > { %v4048_v40 = vmul.f32 %v5463_v50, %v3824_v16  ;;  %5474 = vpow2.f32 %v4636_v52  ;;  %v4637_v36 = vmul.f32 -1.442695, %v3797_v9  ;;  %v3653_v44 = vpop.f32.mrb[60].mxu0 }
 0x331   : > { %v5465_v1 = vpop.eup %5464  ;;  %v6958_v46 = vadd.f32 %v3653_v44, %v2491_v29  ;;  %v3655_v60 = vpop.f32.mrb[61].mxu0 }
 0x332   : > { %v5467_v3 = vpop.eup %5466  ;;  %v4049_v18 = vmul.f32 %v5465_v1, %v3825_v21  ;;  %5476 = vpow2.f32 %v4637_v36  ;;  %v4869_v2 = vadd.f32 %v3655_v60, %v2493_v6  ;;  %v3657_v45 = vpop.f32.mrb[62].mxu0 }
 0x333   : > { %v3956_v58 = vadd.f32 1.0, %v5467_v3  ;;  %v4870_v19 = vadd.f32 %v3657_v45, %v2495_v7  ;;  %v3659_v35 = vpop.f32.mrb[63].mxu0  ;;  %v3798_v28 = vadd.f32 %v6958_v46, %v6800_v26 }
 0x334   : > { %v5469_v51 = vpop.eup %5468  ;;  %v4769_v12 = vpack.c.bf16 %v4049_v18, %v4048_v40  ;;  %v3799_v14 = vadd.f32 %v4869_v2, %v6783_v34  ;;  %v4871_v22 = vadd.f32 %v3659_v35, %v2497_v5 }
 0x335   : > { %5478 = vrcp.f32 %v3956_v58  ;;  %v3957_v54 = vadd.f32 1.0, %v5469_v51  ;;  %v3800_v9 = vadd.f32 %v4870_v19, %v6800_v26  ;;  %v3832_v7 = vmax.f32 %v3798_v28, 0.0 }
 0x336   : > { %4801 = vst [vmem:[%s6825_s18 + $0x58] sm:$0xff] %v4769_v12   ;;  %v4638_v4 = vmul.f32 -1.442695, %v3799_v14  ;;  %v3801_v55 = vadd.f32 %v4871_v22, %v6783_v34  ;;  %v3792_v34 = vadd.f32 %v6940_v15, %v6800_v26  ;;  %v3796_v15 = vadd.f32 %v6951_v62, %v6800_v26 }
 0x337   : > { %v5471_v47 = vpop.eup %5470  ;;  %5480 = vrcp.f32 %v3957_v54  ;;  %v3833_v5 = vmax.f32 %v3800_v9, 0.0 }
 0x338   : > { %v4050_v25 = vmul.f32 %v5471_v47, %v3826_v41  ;;  %5482 = vpow2.f32 %v4638_v4  ;;  %v4639_v32 = vmul.f32 -1.442695, %v3801_v55  ;;  %v3829_v30 = vmax.f32 %v3792_v34, 0.0 }
 0x339   : > { %v5473_v8 = vpop.eup %5472  ;;  %v3831_v31 = vmax.f32 %v3796_v15, 0.0 }
 0x33a   : > { %v5475_v59 = vpop.eup %5474  ;;  %v4051_v57 = vmul.f32 %v5473_v8, %v3827_v61  ;;  %5484 = vpow2.f32 %v4639_v32 }
 0x33b   : > { %v3958_v48 = vadd.f32 1.0, %v5475_v59 }
 0x33c   : > { %v5477_v33 = vpop.eup %5476  ;;  %v4774_v24 = vpack.c.bf16 %v4051_v57, %v4050_v25 }
 0x33d   : > { %5486 = vrcp.f32 %v3958_v48  ;;  %v3959_v20 = vadd.f32 1.0, %v5477_v33 }
 0x33e   : > { %4802 = vst [vmem:[%s6825_s18 + $0x60] sm:$0xff] %v4774_v24  }
 0x33f   : > { %v5479_v49 = vpop.eup %5478  ;;  %5488 = vrcp.f32 %v3959_v20 }
 0x340   : > { %v4052_v13 = vmul.f32 %v5479_v49, %v3828_v37 }
 0x341   : > { %v5481_v39 = vpop.eup %5480 }
 0x342   : > { %v5483_v23 = vpop.eup %5482  ;;  %v4053_v42 = vmul.f32 %v5481_v39, %v3829_v30 }
 0x343   : > { %v3960_v10 = vadd.f32 1.0, %v5483_v23 }
 0x344   : > { %v5485_v17 = vpop.eup %5484  ;;  %v4779_v56 = vpack.c.bf16 %v4053_v42, %v4052_v13 }
 0x345   : > { %5490 = vrcp.f32 %v3960_v10  ;;  %v3961_v0 = vadd.f32 1.0, %v5485_v17 }
 0x346   : > { %4803 = vst [vmem:[%s6825_s18 + $0x68] sm:$0xff] %v4779_v56  }
 0x347   : > { %v5487_v38 = vpop.eup %5486  ;;  %5492 = vrcp.f32 %v3961_v0 }
 0x348   : > { %v4054_v29 = vmul.f32 %v5487_v38, %v3830_v53 }
 0x349   : > { %v5489_v6 = vpop.eup %5488 }
 0x34a   : > { %v4055_v16 = vmul.f32 %v5489_v6, %v3831_v31 }
 0x34c   : > { %v4784_v52 = vpack.c.bf16 %v4055_v16, %v4054_v29 }
 0x34e   : > { %4804 = vst [vmem:[%s6825_s18 + $0x70] sm:$0xff] %v4784_v52  }
 0x34f   : > { %v5491_v62 = vpop.eup %5490 }
 0x350   : > { %v4056_v50 = vmul.f32 %v5491_v62, %v3832_v7 }
 0x351   : > { %v5493_v40 = vpop.eup %5492 }
 0x352   : > { %v4057_v21 = vmul.f32 %v5493_v40, %v3833_v5 }
 0x354   : > { %v4789_v36 = vpack.c.bf16 %v4057_v21, %v4056_v50 }
 0x356   : > { %4805 = vst [vmem:[%s6825_s18 + $0x78] sm:$0xff] %v4789_v36  }
 0x357 PF: > { %s15_s20 = sadd.s32 1, %s5521_s20   ;;  %s7074_s18 = smov %s5517_s19 }
 0x358   : > { %p12_p5 = scmp.ge.s32.totalorder %s15_s20, 4   ;;  %s7075_s19 = smov %s7077_s21 }
 0x35a   :  { %14 = sbr.rel (!%p12_p5) target bundleno = 2 (0x2), region = 84 }

</bundles_post_ra>
